<compile_context>
chip_gen: v7x
topology: tpu7x:2x2x1
jax: 0.10.0
libtpu: 0.0.40
codegen_flags: <defaults>
</compile_context>

<pallas_src>
import functools

import jax
import jax.numpy as jnp
from jax.experimental import pallas as pl
from jax.experimental.pallas import tpu as pltpu


def _round_up(x, m):
    return (x + m - 1) // m * m


def _choose_batch_tile(batch, block_batch):
    """Batch tile: >= 4 grid steps when the batch allows (>=2 per TC on dual-core)."""
    min_steps = 4
    tb = max(8, _round_up(-(-batch // min_steps), 8))
    if tb >= 128:
        tb = _round_up(tb, 128)
    tb = min(tb, max(8, _round_up(block_batch, 8)))
    b_pad = _round_up(batch, tb)
    return tb, b_pad


# -----------------------------------------------------------------------------
# Kernel
# -----------------------------------------------------------------------------
def _resnet_kernel(skip_flags, act_dtype, *refs):
    """Fused ResidualNetwork forward on one (TB, in_pad) batch tile.

    refs = (x_ref, w0, b0, w1, b1, ..., out_ref).  Weight order:
    fc_in, then per residual block fc1 and (fc2  or  fused[fc2; skip]), then fc_out.
    Each weight is stored transposed (in, out) so y = x @ W + b; all matmuls
    accumulate in f32 on the MXU via preferred_element_type.
    """
    x_ref, out_ref = refs[0], refs[-1]
    wb = refs[1:-1]

    def linear(h, k):
        w = wb[2 * k][...]                               # (kin_pad, kout_pad)
        acc = jnp.dot(h.astype(w.dtype), w, preferred_element_type=jnp.float32)
        return acc + wb[2 * k + 1][...]                  # (1, kout_pad) f32 bias

    def linear_act(h, k):
        return jax.nn.relu(linear(h, k).astype(act_dtype))

    k = 0
    h = linear_act(x_ref[...], k); k += 1                # fc_in + relu

    for has_skip in skip_flags:
        out = linear_act(h, k); k += 1                   # fc1 + relu
        if has_skip:
            # fused fc2 + skip_connection (+ residual add inside the MXU accumulator)
            h = linear_act(jnp.concatenate([out, h], axis=-1), k); k += 1
        else:
            z = linear(out, k); k += 1                   # fc2
            h = jax.nn.relu(z.astype(act_dtype) + h)     # identity residual + relu

    out_ref[...] = linear(h, k).astype(out_ref.dtype)    # fc_out (no activation)


# -----------------------------------------------------------------------------
# Parameter construction (mimics nn.Linear default init) + packing
# -----------------------------------------------------------------------------
def _init_linear(key, in_features, out_features):
    kw, kb = jax.random.split(key)
    bound = 1.0 / jnp.sqrt(jnp.float32(in_features))
    # stored as (in, out) = W^T so the kernel does x @ W + b
    w = jax.random.uniform(kw, (in_features, out_features), jnp.float32, -bound, bound)
    b = jax.random.uniform(kb, (out_features,), jnp.float32, -bound, bound)
    return w, b


def make_raw_params(key, input_size, hidden_layer_sizes, output_size):
    """Returns (list of (w, b) in layer order, skip_flags)."""
    raw, skip_flags = [], []
    n_layers = 1 + 3 * (len(hidden_layer_sizes) - 1) + 1
    keys = jax.random.split(key, n_layers)
    k = 0

    raw.append(_init_linear(keys[k], input_size, hidden_layer_sizes[0])); k += 1   # fc_in

    for i in range(len(hidden_layer_sizes) - 1):
        fin, fout = hidden_layer_sizes[i], hidden_layer_sizes[i + 1]
        raw.append(_init_linear(keys[k], fin, fout)); k += 1     # fc1
        raw.append(_init_linear(keys[k], fout, fout)); k += 1    # fc2
        if fin != fout:
            raw.append(_init_linear(keys[k], fin, fout))         # skip_connection
            skip_flags.append(True)
        else:
            skip_flags.append(False)
        k += 1

    raw.append(_init_linear(keys[k], hidden_layer_sizes[-1], output_size))          # fc_out
    return raw, tuple(skip_flags)


def pack_params(raw_params, skip_flags, weight_dtype=jnp.bfloat16):
    """Pad each linear to (round_up(in,128), round_up(out,128)), fuse fc2+skip for
    blocks with a linear skip, and return a flat [w0, b0, w1, b1, ...] list."""

    def pad_wb(w, b, kin_p, kout_p):
        wp = jnp.zeros((kin_p, kout_p), jnp.float32).at[:w.shape[0], :w.shape[1]].set(w)
        bp = jnp.zeros((1, kout_p), jnp.float32).at[0, :b.shape[0]].set(b)
        return [wp.astype(weight_dtype), bp]               # bias stays f32

    flat, idx = [], 0
    w, b = raw_params[idx]; idx += 1                                                 # fc_in
    flat += pad_wb(w, b, _round_up(w.shape[0], 128), _round_up(w.shape[1], 128))

    for has_skip in skip_flags:
        w1, b1 = raw_params[idx]; idx += 1                                           # fc1
        w2, b2 = raw_params[idx]; idx += 1                                           # fc2
        kin_p = _round_up(w1.shape[0], 128)
        kout_p = _round_up(w1.shape[1], 128)
        flat += pad_wb(w1, b1, kin_p, kout_p)
        if has_skip:
            ws, bs_ = raw_params[idx]; idx += 1                                      # skip
            # fused [W_fc2 ; W_skip] : (kout_p + kin_p, kout_p), bias = b2 + bs
            wf = jnp.zeros((kout_p + kin_p, kout_p), jnp.float32)
            wf = wf.at[:w2.shape[0], :w2.shape[1]].set(w2)
            wf = wf.at[kout_p:kout_p + ws.shape[0], :ws.shape[1]].set(ws)
            bf = jnp.zeros((1, kout_p), jnp.float32).at[0, :b2.shape[0]].set(b2 + bs_)
            flat += [wf.astype(weight_dtype), bf]
        else:
            flat += pad_wb(w2, b2, kout_p, kout_p)

    w, b = raw_params[idx]                                                           # fc_out
    flat += pad_wb(w, b, _round_up(w.shape[0], 128), _round_up(w.shape[1], 128))
    return flat


# -----------------------------------------------------------------------------
# Wrapper calling pallas_call
# -----------------------------------------------------------------------------
def residual_network_forward(x, flat_params, skip_flags, output_size, *,
                             act_dtype=jnp.bfloat16, block_batch=512):
    batch, in_features = x.shape
    in_pad = flat_params[0].shape[0]          # round_up(input_size, 128)
    out_pad = flat_params[-2].shape[1]        # round_up(output_size, 128)

    tb, b_pad = _choose_batch_tile(batch, block_batch)
    grid = (b_pad // tb,)

    # Zero-pad batch and input features (lane-dense, exact under matmul + ReLU).
    x_pad = jnp.zeros((b_pad, in_pad), jnp.float32).at[:batch, :in_features].set(x)

    kernel = functools.partial(_resnet_kernel, tuple(skip_flags), act_dtype)

    # --- generation-aware VMEM budget -------------------------------------------
    try:
        vmem_cap = int(pltpu.get_tpu_info().vmem_capacity_bytes)
    except Exception:
        vmem_cap = 64 << 20                                   # conservative (fits v7x)
    param_bytes = sum(int(a.size) * a.dtype.itemsize for a in flat_params)
    widest = max(max(w.shape) for w in flat_params[0::2])
    live_bytes = 8 * tb * widest * 4                          # h / out / cat / acc f32
    io_bytes = 2 * tb * in_pad * 4 + 2 * tb * out_pad * 4     # double-buffered x / out
    vmem_limit = int(min(max(2 * param_bytes + io_bytes + live_bytes + (16 << 20),
                             32 << 20),
                         int(0.9 * vmem_cap)))

    flops = sum(2 * b_pad * w.shape[0] * w.shape[1] for w in flat_params[0::2])
    bytes_accessed = int(x_pad.size * 4 + param_bytes + b_pad * out_pad * 4)

    def build(weight_mode):
        def resident_spec(shape):
            zeros = (0,) * len(shape)
            if weight_mode is None:
                return pl.BlockSpec(shape, lambda i, z=zeros: z)
            return pl.BlockSpec(shape, lambda i, z=zeros: z, pipeline_mode=weight_mode)

        in_specs = [pl.BlockSpec((tb, in_pad), lambda i: (i, 0))]      # x batch tile
        in_specs += [resident_spec(a.shape) for a in flat_params]      # resident params

        return pl.pallas_call(
            kernel,
            out_shape=jax.ShapeDtypeStruct((b_pad, out_pad), jnp.float32),
            grid_spec=pltpu.PrefetchScalarGridSpec(
                num_scalar_prefetch=0,
                grid=grid,
                in_specs=in_specs,
                out_specs=pl.BlockSpec((tb, out_pad), lambda i: (i, 0)),
            ),
            compiler_params=pltpu.CompilerParams(
                dimension_semantics=("parallel",),
                vmem_limit_bytes=vmem_limit,
            ),
            cost_estimate=pl.CostEstimate(
                flops=flops, transcendentals=0, bytes_accessed=bytes_accessed),
        )

    try:
        # Single-buffer the grid-invariant weight/bias blocks (fetched once, resident).
        out = jax.block_until_ready(build(pl.Buffered(1))(x_pad, *flat_params))
    except Exception:
        # Fallback: default pipelining for the resident blocks.
        out = jax.block_until_ready(build(None)(x_pad, *flat_params))

    return out[:batch, :output_size]


# -----------------------------------------------------------------------------
# Pure-JAX reference (f32/f32 path matches the PyTorch forward exactly)
# -----------------------------------------------------------------------------
def reference_forward(x, raw_params, skip_flags,
                      weight_dtype=jnp.float32, act_dtype=jnp.float32):
    def linear(h, wb):
        w, b = wb
        return jnp.dot(h.astype(weight_dtype), w.astype(weight_dtype),
                       preferred_element_type=jnp.float32) + b

    idx = 0
    h = jax.nn.relu(linear(x, raw_params[idx]).astype(act_dtype)); idx += 1
    for has_skip in skip_flags:
        out = jax.nn.relu(linear(h, raw_params[idx]).astype(act_dtype)); idx += 1
        z = linear(out, raw_params[idx]); idx += 1
        if has_skip:
            z = z + linear(h, raw_params[idx]); idx += 1
            h = jax.nn.relu(z.astype(act_dtype))
        else:
            h = jax.nn.relu(z.astype(act_dtype) + h)
    return linear(h, raw_params[idx])


# -----------------------------------------------------------------------------
if __name__ == "__main__":
    batch = 128
    input_size = 16
    hidden_layer_sizes = [32, 32, 64]   # block0: identity skip, block1: linear skip
    output_size = 8

    key = jax.random.PRNGKey(0)
    k_x, k_p = jax.random.split(key)
    x = jax.random.normal(k_x, (batch, input_size), jnp.float32)

    raw_params, skip_flags = make_raw_params(k_p, input_size, hidden_layer_sizes, output_size)

    # --- f32 weights / f32 activations: strict check vs PyTorch-equivalent reference ---
    flat32 = pack_params(raw_params, skip_flags, weight_dtype=jnp.float32)
    y32 = residual_network_forward(x, flat32, skip_flags, output_size,
                                   act_dtype=jnp.float32, block_batch=512)
    y_ref = reference_forward(x, raw_params, skip_flags)
    assert y32.shape == (batch, output_size)
    assert jnp.allclose(y32, y_ref, atol=1e-4, rtol=1e-4), "f32 mismatch vs reference"

    # --- default fast path: bf16 weights + bf16 activations, f32 MXU accumulation ---
    flatbf = pack_params(raw_params, skip_flags, weight_dtype=jnp.bfloat16)
    ybf = residual_network_forward(x, flatbf, skip_flags, output_size,
                                   act_dtype=jnp.bfloat16, block_batch=512)
    y_ref_bf = reference_forward(x, raw_params, skip_flags,
                                 weight_dtype=jnp.bfloat16, act_dtype=jnp.bfloat16)
    assert ybf.shape == (batch, output_size)
    assert jnp.allclose(ybf, y_ref_bf, atol=2e-2, rtol=2e-2), "bf16 mismatch vs reference"

    print("KERNEL_OK")
</pallas_src>

<mosaic_0001>
module attributes {stable_mosaic.version = 11 : i64} {
  func.func @_resnet_kernel(%arg0: i32, %arg1: memref<32x128xf32, #tpu.memory_space<vmem>>, %arg2: memref<128x128xf32, #tpu.memory_space<vmem>>, %arg3: memref<1x128xf32, #tpu.memory_space<vmem>>, %arg4: memref<128x128xf32, #tpu.memory_space<vmem>>, %arg5: memref<1x128xf32, #tpu.memory_space<vmem>>, %arg6: memref<128x128xf32, #tpu.memory_space<vmem>>, %arg7: memref<1x128xf32, #tpu.memory_space<vmem>>, %arg8: memref<128x128xf32, #tpu.memory_space<vmem>>, %arg9: memref<1x128xf32, #tpu.memory_space<vmem>>, %arg10: memref<256x128xf32, #tpu.memory_space<vmem>>, %arg11: memref<1x128xf32, #tpu.memory_space<vmem>>, %arg12: memref<128x128xf32, #tpu.memory_space<vmem>>, %arg13: memref<1x128xf32, #tpu.memory_space<vmem>>, %arg14: memref<32x128xf32, #tpu.memory_space<vmem>>) attributes {dimension_semantics = [#tpu.dimension_semantics<parallel>], iteration_bounds = array<i64: 4>, scalar_prefetch = 0 : i64, scratch_operands = 0 : i64, tpu.core_type = #tpu.core_type<tc>, window_params = [{transform_indices = @transform_0, window_bounds = array<i64: 32, 128>}, {pipeline_mode = #tpu.pipeline_mode<synchronous>, transform_indices = @transform_1, window_bounds = array<i64: 128, 128>}, {pipeline_mode = #tpu.pipeline_mode<synchronous>, transform_indices = @transform_2, window_bounds = array<i64: 1, 128>}, {pipeline_mode = #tpu.pipeline_mode<synchronous>, transform_indices = @transform_3, window_bounds = array<i64: 128, 128>}, {pipeline_mode = #tpu.pipeline_mode<synchronous>, transform_indices = @transform_4, window_bounds = array<i64: 1, 128>}, {pipeline_mode = #tpu.pipeline_mode<synchronous>, transform_indices = @transform_5, window_bounds = array<i64: 128, 128>}, {pipeline_mode = #tpu.pipeline_mode<synchronous>, transform_indices = @transform_6, window_bounds = array<i64: 1, 128>}, {pipeline_mode = #tpu.pipeline_mode<synchronous>, transform_indices = @transform_7, window_bounds = array<i64: 128, 128>}, {pipeline_mode = #tpu.pipeline_mode<synchronous>, transform_indices = @transform_8, window_bounds = array<i64: 1, 128>}, {pipeline_mode = #tpu.pipeline_mode<synchronous>, transform_indices = @transform_9, window_bounds = array<i64: 256, 128>}, {pipeline_mode = #tpu.pipeline_mode<synchronous>, transform_indices = @transform_10, window_bounds = array<i64: 1, 128>}, {pipeline_mode = #tpu.pipeline_mode<synchronous>, transform_indices = @transform_11, window_bounds = array<i64: 128, 128>}, {pipeline_mode = #tpu.pipeline_mode<synchronous>, transform_indices = @transform_12, window_bounds = array<i64: 1, 128>}, {transform_indices = @transform_13, window_bounds = array<i64: 32, 128>}]} {
    %c0 = arith.constant 0 : index
    %c0_0 = arith.constant 0 : index
    %0 = vector.load %arg1[%c0, %c0_0] : memref<32x128xf32, #tpu.memory_space<vmem>>, vector<32x128xf32>
    %c0_1 = arith.constant 0 : index
    %c0_2 = arith.constant 0 : index
    %1 = vector.load %arg2[%c0_1, %c0_2] : memref<128x128xf32, #tpu.memory_space<vmem>>, vector<128x128xf32>
    %cst = arith.constant dense<0.000000e+00> : vector<32x128xf32>
    %2 = tpu.matmul %0, %1, %cst {dimension_numbers = #tpu.dot_dimension_numbers<[1], [0], [0], [1], [0, 0, 1, 1], [], []>} : vector<32x128xf32>, vector<128x128xf32>, vector<32x128xf32> -> vector<32x128xf32>
    %c0_3 = arith.constant 0 : index
    %c0_4 = arith.constant 0 : index
    %3 = vector.load %arg3[%c0_3, %c0_4] : memref<1x128xf32, #tpu.memory_space<vmem>>, vector<1x128xf32>
    %4 = vector.broadcast %3 : vector<1x128xf32> to vector<32x128xf32>
    %5 = arith.addf %2, %4 : vector<32x128xf32>
    %cst_5 = arith.constant 0.000000e+00 : f32
    %6 = vector.broadcast %cst_5 : f32 to vector<32x128xf32>
    %7 = arith.maximumf %5, %6 : vector<32x128xf32>
    %c0_6 = arith.constant 0 : index
    %c0_7 = arith.constant 0 : index
    %8 = vector.load %arg4[%c0_6, %c0_7] : memref<128x128xf32, #tpu.memory_space<vmem>>, vector<128x128xf32>
    %cst_8 = arith.constant dense<0.000000e+00> : vector<32x128xf32>
    %9 = tpu.matmul %7, %8, %cst_8 {dimension_numbers = #tpu.dot_dimension_numbers<[1], [0], [0], [1], [0, 0, 1, 1], [], []>} : vector<32x128xf32>, vector<128x128xf32>, vector<32x128xf32> -> vector<32x128xf32>
    %c0_9 = arith.constant 0 : index
    %c0_10 = arith.constant 0 : index
    %10 = vector.load %arg5[%c0_9, %c0_10] : memref<1x128xf32, #tpu.memory_space<vmem>>, vector<1x128xf32>
    %11 = vector.broadcast %10 : vector<1x128xf32> to vector<32x128xf32>
    %12 = arith.addf %9, %11 : vector<32x128xf32>
    %cst_11 = arith.constant 0.000000e+00 : f32
    %13 = vector.broadcast %cst_11 : f32 to vector<32x128xf32>
    %14 = arith.maximumf %12, %13 : vector<32x128xf32>
    %c0_12 = arith.constant 0 : index
    %c0_13 = arith.constant 0 : index
    %15 = vector.load %arg6[%c0_12, %c0_13] : memref<128x128xf32, #tpu.memory_space<vmem>>, vector<128x128xf32>
    %cst_14 = arith.constant dense<0.000000e+00> : vector<32x128xf32>
    %16 = tpu.matmul %14, %15, %cst_14 {dimension_numbers = #tpu.dot_dimension_numbers<[1], [0], [0], [1], [0, 0, 1, 1], [], []>} : vector<32x128xf32>, vector<128x128xf32>, vector<32x128xf32> -> vector<32x128xf32>
    %c0_15 = arith.constant 0 : index
    %c0_16 = arith.constant 0 : index
    %17 = vector.load %arg7[%c0_15, %c0_16] : memref<1x128xf32, #tpu.memory_space<vmem>>, vector<1x128xf32>
    %18 = vector.broadcast %17 : vector<1x128xf32> to vector<32x128xf32>
    %19 = arith.addf %16, %18 : vector<32x128xf32>
    %20 = arith.addf %19, %7 : vector<32x128xf32>
    %cst_17 = arith.constant 0.000000e+00 : f32
    %21 = vector.broadcast %cst_17 : f32 to vector<32x128xf32>
    %22 = arith.maximumf %20, %21 : vector<32x128xf32>
    %c0_18 = arith.constant 0 : index
    %c0_19 = arith.constant 0 : index
    %23 = vector.load %arg8[%c0_18, %c0_19] : memref<128x128xf32, #tpu.memory_space<vmem>>, vector<128x128xf32>
    %cst_20 = arith.constant dense<0.000000e+00> : vector<32x128xf32>
    %24 = tpu.matmul %22, %23, %cst_20 {dimension_numbers = #tpu.dot_dimension_numbers<[1], [0], [0], [1], [0, 0, 1, 1], [], []>} : vector<32x128xf32>, vector<128x128xf32>, vector<32x128xf32> -> vector<32x128xf32>
    %c0_21 = arith.constant 0 : index
    %c0_22 = arith.constant 0 : index
    %25 = vector.load %arg9[%c0_21, %c0_22] : memref<1x128xf32, #tpu.memory_space<vmem>>, vector<1x128xf32>
    %26 = vector.broadcast %25 : vector<1x128xf32> to vector<32x128xf32>
    %27 = arith.addf %24, %26 : vector<32x128xf32>
    %cst_23 = arith.constant 0.000000e+00 : f32
    %28 = vector.broadcast %cst_23 : f32 to vector<32x128xf32>
    %29 = arith.maximumf %27, %28 : vector<32x128xf32>
    %30 = tpu.concatenate %29, %22 in 1 : vector<32x128xf32>, vector<32x128xf32> -> vector<32x256xf32>
    %c0_24 = arith.constant 0 : index
    %c0_25 = arith.constant 0 : index
    %31 = vector.load %arg10[%c0_24, %c0_25] : memref<256x128xf32, #tpu.memory_space<vmem>>, vector<256x128xf32>
    %cst_26 = arith.constant dense<0.000000e+00> : vector<32x128xf32>
    %32 = tpu.matmul %30, %31, %cst_26 {dimension_numbers = #tpu.dot_dimension_numbers<[1], [0], [0], [1], [0, 0, 1, 1], [], []>} : vector<32x256xf32>, vector<256x128xf32>, vector<32x128xf32> -> vector<32x128xf32>
    %c0_27 = arith.constant 0 : index
    %c0_28 = arith.constant 0 : index
    %33 = vector.load %arg11[%c0_27, %c0_28] : memref<1x128xf32, #tpu.memory_space<vmem>>, vector<1x128xf32>
    %34 = vector.broadcast %33 : vector<1x128xf32> to vector<32x128xf32>
    %35 = arith.addf %32, %34 : vector<32x128xf32>
    %cst_29 = arith.constant 0.000000e+00 : f32
    %36 = vector.broadcast %cst_29 : f32 to vector<32x128xf32>
    %37 = arith.maximumf %35, %36 : vector<32x128xf32>
    %c0_30 = arith.constant 0 : index
    %c0_31 = arith.constant 0 : index
    %38 = vector.load %arg12[%c0_30, %c0_31] : memref<128x128xf32, #tpu.memory_space<vmem>>, vector<128x128xf32>
    %cst_32 = arith.constant dense<0.000000e+00> : vector<32x128xf32>
    %39 = tpu.matmul %37, %38, %cst_32 {dimension_numbers = #tpu.dot_dimension_numbers<[1], [0], [0], [1], [0, 0, 1, 1], [], []>} : vector<32x128xf32>, vector<128x128xf32>, vector<32x128xf32> -> vector<32x128xf32>
    %c0_33 = arith.constant 0 : index
    %c0_34 = arith.constant 0 : index
    %40 = vector.load %arg13[%c0_33, %c0_34] : memref<1x128xf32, #tpu.memory_space<vmem>>, vector<1x128xf32>
    %41 = vector.broadcast %40 : vector<1x128xf32> to vector<32x128xf32>
    %42 = arith.addf %39, %41 : vector<32x128xf32>
    %c0_35 = arith.constant 0 : index
    %c0_36 = arith.constant 0 : index
    %43 = vector.load %arg14[%c0_35, %c0_36] : memref<32x128xf32, #tpu.memory_space<vmem>>, vector<32x128xf32>
    tpu.vector_store %arg14[%c0_35, %c0_36], %42 {strides = array<i32>} : memref<32x128xf32, #tpu.memory_space<vmem>>, vector<32x128xf32>,
    return
  }
  func.func @transform_0(%arg0: i32) -> (i32, i32) {
    %c0_i32 = arith.constant 0 : i32
    %c0_i32_0 = arith.constant 0 : i32
    return %arg0, %c0_i32 : i32, i32
  }
  func.func @transform_1(%arg0: i32) -> (i32, i32) {
    %c0_i32 = arith.constant 0 : i32
    %c0_i32_0 = arith.constant 0 : i32
    %c0_i32_1 = arith.constant 0 : i32
    return %c0_i32, %c0_i32_0 : i32, i32
  }
  func.func @transform_2(%arg0: i32) -> (i32, i32) {
    %c0_i32 = arith.constant 0 : i32
    %c0_i32_0 = arith.constant 0 : i32
    %c0_i32_1 = arith.constant 0 : i32
    return %c0_i32, %c0_i32_0 : i32, i32
  }
  func.func @transform_3(%arg0: i32) -> (i32, i32) {
    %c0_i32 = arith.constant 0 : i32
    %c0_i32_0 = arith.constant 0 : i32
    %c0_i32_1 = arith.constant 0 : i32
    return %c0_i32, %c0_i32_0 : i32, i32
  }
  func.func @transform_4(%arg0: i32) -> (i32, i32) {
    %c0_i32 = arith.constant 0 : i32
    %c0_i32_0 = arith.constant 0 : i32
    %c0_i32_1 = arith.constant 0 : i32
    return %c0_i32, %c0_i32_0 : i32, i32
  }
  func.func @transform_5(%arg0: i32) -> (i32, i32) {
    %c0_i32 = arith.constant 0 : i32
    %c0_i32_0 = arith.constant 0 : i32
    %c0_i32_1 = arith.constant 0 : i32
    return %c0_i32, %c0_i32_0 : i32, i32
  }
  func.func @transform_6(%arg0: i32) -> (i32, i32) {
    %c0_i32 = arith.constant 0 : i32
    %c0_i32_0 = arith.constant 0 : i32
    %c0_i32_1 = arith.constant 0 : i32
    return %c0_i32, %c0_i32_0 : i32, i32
  }
  func.func @transform_7(%arg0: i32) -> (i32, i32) {
    %c0_i32 = arith.constant 0 : i32
    %c0_i32_0 = arith.constant 0 : i32
    %c0_i32_1 = arith.constant 0 : i32
    return %c0_i32, %c0_i32_0 : i32, i32
  }
  func.func @transform_8(%arg0: i32) -> (i32, i32) {
    %c0_i32 = arith.constant 0 : i32
    %c0_i32_0 = arith.constant 0 : i32
    %c0_i32_1 = arith.constant 0 : i32
    return %c0_i32, %c0_i32_0 : i32, i32
  }
  func.func @transform_9(%arg0: i32) -> (i32, i32) {
    %c0_i32 = arith.constant 0 : i32
    %c0_i32_0 = arith.constant 0 : i32
    %c0_i32_1 = arith.constant 0 : i32
    return %c0_i32, %c0_i32_0 : i32, i32
  }
  func.func @transform_10(%arg0: i32) -> (i32, i32) {
    %c0_i32 = arith.constant 0 : i32
    %c0_i32_0 = arith.constant 0 : i32
    %c0_i32_1 = arith.constant 0 : i32
    return %c0_i32, %c0_i32_0 : i32, i32
  }
  func.func @transform_11(%arg0: i32) -> (i32, i32) {
    %c0_i32 = arith.constant 0 : i32
    %c0_i32_0 = arith.constant 0 : i32
    %c0_i32_1 = arith.constant 0 : i32
    return %c0_i32, %c0_i32_0 : i32, i32
  }
  func.func @transform_12(%arg0: i32) -> (i32, i32) {
    %c0_i32 = arith.constant 0 : i32
    %c0_i32_0 = arith.constant 0 : i32
    %c0_i32_1 = arith.constant 0 : i32
    return %c0_i32, %c0_i32_0 : i32, i32
  }
  func.func @transform_13(%arg0: i32) -> (i32, i32) {
    %c0_i32 = arith.constant 0 : i32
    %c0_i32_0 = arith.constant 0 : i32
    return %arg0, %c0_i32 : i32, i32
  }
}

module attributes {stable_mosaic.version = 11 : i64} {
  func.func @_resnet_kernel(%arg0: i32, %arg1: memref<32x128xf32, #tpu.memory_space<vmem>>, %arg2: memref<128x128xf32, #tpu.memory_space<vmem>>, %arg3: memref<1x128xf32, #tpu.memory_space<vmem>>, %arg4: memref<128x128xf32, #tpu.memory_space<vmem>>, %arg5: memref<1x128xf32, #tpu.memory_space<vmem>>, %arg6: memref<128x128xf32, #tpu.memory_space<vmem>>, %arg7: memref<1x128xf32, #tpu.memory_space<vmem>>, %arg8: memref<128x128xf32, #tpu.memory_space<vmem>>, %arg9: memref<1x128xf32, #tpu.memory_space<vmem>>, %arg10: memref<256x128xf32, #tpu.memory_space<vmem>>, %arg11: memref<1x128xf32, #tpu.memory_space<vmem>>, %arg12: memref<128x128xf32, #tpu.memory_space<vmem>>, %arg13: memref<1x128xf32, #tpu.memory_space<vmem>>, %arg14: memref<32x128xf32, #tpu.memory_space<vmem>>) attributes {dimension_semantics = [#tpu.dimension_semantics<parallel>], iteration_bounds = array<i64: 4>, scalar_prefetch = 0 : i64, scratch_operands = 0 : i64, tpu.core_type = #tpu.core_type<tc>, window_params = [{transform_indices = @transform_0, window_bounds = array<i64: 32, 128>}, {pipeline_mode = #tpu.pipeline_mode<synchronous>, transform_indices = @transform_1, window_bounds = array<i64: 128, 128>}, {pipeline_mode = #tpu.pipeline_mode<synchronous>, transform_indices = @transform_2, window_bounds = array<i64: 1, 128>}, {pipeline_mode = #tpu.pipeline_mode<synchronous>, transform_indices = @transform_3, window_bounds = array<i64: 128, 128>}, {pipeline_mode = #tpu.pipeline_mode<synchronous>, transform_indices = @transform_4, window_bounds = array<i64: 1, 128>}, {pipeline_mode = #tpu.pipeline_mode<synchronous>, transform_indices = @transform_5, window_bounds = array<i64: 128, 128>}, {pipeline_mode = #tpu.pipeline_mode<synchronous>, transform_indices = @transform_6, window_bounds = array<i64: 1, 128>}, {pipeline_mode = #tpu.pipeline_mode<synchronous>, transform_indices = @transform_7, window_bounds = array<i64: 128, 128>}, {pipeline_mode = #tpu.pipeline_mode<synchronous>, transform_indices = @transform_8, window_bounds = array<i64: 1, 128>}, {pipeline_mode = #tpu.pipeline_mode<synchronous>, transform_indices = @transform_9, window_bounds = array<i64: 256, 128>}, {pipeline_mode = #tpu.pipeline_mode<synchronous>, transform_indices = @transform_10, window_bounds = array<i64: 1, 128>}, {pipeline_mode = #tpu.pipeline_mode<synchronous>, transform_indices = @transform_11, window_bounds = array<i64: 128, 128>}, {pipeline_mode = #tpu.pipeline_mode<synchronous>, transform_indices = @transform_12, window_bounds = array<i64: 1, 128>}, {transform_indices = @transform_13, window_bounds = array<i64: 32, 128>}]} {
    %c0 = arith.constant 0 : index
    %c0_0 = arith.constant 0 : index
    %0 = vector.load %arg1[%c0, %c0_0] : memref<32x128xf32, #tpu.memory_space<vmem>>, vector<32x128xf32>
    %c0_1 = arith.constant 0 : index
    %c0_2 = arith.constant 0 : index
    %1 = vector.load %arg2[%c0_1, %c0_2] : memref<128x128xf32, #tpu.memory_space<vmem>>, vector<128x128xf32>
    %cst = arith.constant dense<0.000000e+00> : vector<32x128xf32>
    %2 = tpu.matmul %0, %1, %cst {dimension_numbers = #tpu.dot_dimension_numbers<[1], [0], [0], [1], [0, 0, 1, 1], [], []>} : vector<32x128xf32>, vector<128x128xf32>, vector<32x128xf32> -> vector<32x128xf32>
    %c0_3 = arith.constant 0 : index
    %c0_4 = arith.constant 0 : index
    %3 = vector.load %arg3[%c0_3, %c0_4] : memref<1x128xf32, #tpu.memory_space<vmem>>, vector<1x128xf32>
    %4 = vector.broadcast %3 : vector<1x128xf32> to vector<32x128xf32>
    %5 = arith.addf %2, %4 : vector<32x128xf32>
    %cst_5 = arith.constant 0.000000e+00 : f32
    %6 = vector.broadcast %cst_5 : f32 to vector<32x128xf32>
    %7 = arith.maximumf %5, %6 : vector<32x128xf32>
    %c0_6 = arith.constant 0 : index
    %c0_7 = arith.constant 0 : index
    %8 = vector.load %arg4[%c0_6, %c0_7] : memref<128x128xf32, #tpu.memory_space<vmem>>, vector<128x128xf32>
    %cst_8 = arith.constant dense<0.000000e+00> : vector<32x128xf32>
    %9 = tpu.matmul %7, %8, %cst_8 {dimension_numbers = #tpu.dot_dimension_numbers<[1], [0], [0], [1], [0, 0, 1, 1], [], []>} : vector<32x128xf32>, vector<128x128xf32>, vector<32x128xf32> -> vector<32x128xf32>
    %c0_9 = arith.constant 0 : index
    %c0_10 = arith.constant 0 : index
    %10 = vector.load %arg5[%c0_9, %c0_10] : memref<1x128xf32, #tpu.memory_space<vmem>>, vector<1x128xf32>
    %11 = vector.broadcast %10 : vector<1x128xf32> to vector<32x128xf32>
    %12 = arith.addf %9, %11 : vector<32x128xf32>
    %cst_11 = arith.constant 0.000000e+00 : f32
    %13 = vector.broadcast %cst_11 : f32 to vector<32x128xf32>
    %14 = arith.maximumf %12, %13 : vector<32x128xf32>
    %c0_12 = arith.constant 0 : index
    %c0_13 = arith.constant 0 : index
    %15 = vector.load %arg6[%c0_12, %c0_13] : memref<128x128xf32, #tpu.memory_space<vmem>>, vector<128x128xf32>
    %cst_14 = arith.constant dense<0.000000e+00> : vector<32x128xf32>
    %16 = tpu.matmul %14, %15, %cst_14 {dimension_numbers = #tpu.dot_dimension_numbers<[1], [0], [0], [1], [0, 0, 1, 1], [], []>} : vector<32x128xf32>, vector<128x128xf32>, vector<32x128xf32> -> vector<32x128xf32>
    %c0_15 = arith.constant 0 : index
    %c0_16 = arith.constant 0 : index
    %17 = vector.load %arg7[%c0_15, %c0_16] : memref<1x128xf32, #tpu.memory_space<vmem>>, vector<1x128xf32>
    %18 = vector.broadcast %17 : vector<1x128xf32> to vector<32x128xf32>
    %19 = arith.addf %16, %18 : vector<32x128xf32>
    %20 = arith.addf %19, %7 : vector<32x128xf32>
    %cst_17 = arith.constant 0.000000e+00 : f32
    %21 = vector.broadcast %cst_17 : f32 to vector<32x128xf32>
    %22 = arith.maximumf %20, %21 : vector<32x128xf32>
    %c0_18 = arith.constant 0 : index
    %c0_19 = arith.constant 0 : index
    %23 = vector.load %arg8[%c0_18, %c0_19] : memref<128x128xf32, #tpu.memory_space<vmem>>, vector<128x128xf32>
    %cst_20 = arith.constant dense<0.000000e+00> : vector<32x128xf32>
    %24 = tpu.matmul %22, %23, %cst_20 {dimension_numbers = #tpu.dot_dimension_numbers<[1], [0], [0], [1], [0, 0, 1, 1], [], []>} : vector<32x128xf32>, vector<128x128xf32>, vector<32x128xf32> -> vector<32x128xf32>
    %c0_21 = arith.constant 0 : index
    %c0_22 = arith.constant 0 : index
    %25 = vector.load %arg9[%c0_21, %c0_22] : memref<1x128xf32, #tpu.memory_space<vmem>>, vector<1x128xf32>
    %26 = vector.broadcast %25 : vector<1x128xf32> to vector<32x128xf32>
    %27 = arith.addf %24, %26 : vector<32x128xf32>
    %cst_23 = arith.constant 0.000000e+00 : f32
    %28 = vector.broadcast %cst_23 : f32 to vector<32x128xf32>
    %29 = arith.maximumf %27, %28 : vector<32x128xf32>
    %30 = tpu.concatenate %29, %22 in 1 : vector<32x128xf32>, vector<32x128xf32> -> vector<32x256xf32>
    %c0_24 = arith.constant 0 : index
    %c0_25 = arith.constant 0 : index
    %31 = vector.load %arg10[%c0_24, %c0_25] : memref<256x128xf32, #tpu.memory_space<vmem>>, vector<256x128xf32>
    %cst_26 = arith.constant dense<0.000000e+00> : vector<32x128xf32>
    %32 = tpu.matmul %30, %31, %cst_26 {dimension_numbers = #tpu.dot_dimension_numbers<[1], [0], [0], [1], [0, 0, 1, 1], [], []>} : vector<32x256xf32>, vector<256x128xf32>, vector<32x128xf32> -> vector<32x128xf32>
    %c0_27 = arith.constant 0 : index
    %c0_28 = arith.constant 0 : index
    %33 = vector.load %arg11[%c0_27, %c0_28] : memref<1x128xf32, #tpu.memory_space<vmem>>, vector<1x128xf32>
    %34 = vector.broadcast %33 : vector<1x128xf32> to vector<32x128xf32>
    %35 = arith.addf %32, %34 : vector<32x128xf32>
    %cst_29 = arith.constant 0.000000e+00 : f32
    %36 = vector.broadcast %cst_29 : f32 to vector<32x128xf32>
    %37 = arith.maximumf %35, %36 : vector<32x128xf32>
    %c0_30 = arith.constant 0 : index
    %c0_31 = arith.constant 0 : index
    %38 = vector.load %arg12[%c0_30, %c0_31] : memref<128x128xf32, #tpu.memory_space<vmem>>, vector<128x128xf32>
    %cst_32 = arith.constant dense<0.000000e+00> : vector<32x128xf32>
    %39 = tpu.matmul %37, %38, %cst_32 {dimension_numbers = #tpu.dot_dimension_numbers<[1], [0], [0], [1], [0, 0, 1, 1], [], []>} : vector<32x128xf32>, vector<128x128xf32>, vector<32x128xf32> -> vector<32x128xf32>
    %c0_33 = arith.constant 0 : index
    %c0_34 = arith.constant 0 : index
    %40 = vector.load %arg13[%c0_33, %c0_34] : memref<1x128xf32, #tpu.memory_space<vmem>>, vector<1x128xf32>
    %41 = vector.broadcast %40 : vector<1x128xf32> to vector<32x128xf32>
    %42 = arith.addf %39, %41 : vector<32x128xf32>
    %c0_35 = arith.constant 0 : index
    %c0_36 = arith.constant 0 : index
    %43 = vector.load %arg14[%c0_35, %c0_36] : memref<32x128xf32, #tpu.memory_space<vmem>>, vector<32x128xf32>
    tpu.vector_store %arg14[%c0_35, %c0_36], %42 {strides = array<i32>} : memref<32x128xf32, #tpu.memory_space<vmem>>, vector<32x128xf32>,
    return
  }
  func.func @transform_0(%arg0: i32) -> (i32, i32) {
    %c0_i32 = arith.constant 0 : i32
    %c0_i32_0 = arith.constant 0 : i32
    return %arg0, %c0_i32 : i32, i32
  }
  func.func @transform_1(%arg0: i32) -> (i32, i32) {
    %c0_i32 = arith.constant 0 : i32
    %c0_i32_0 = arith.constant 0 : i32
    %c0_i32_1 = arith.constant 0 : i32
    return %c0_i32, %c0_i32_0 : i32, i32
  }
  func.func @transform_2(%arg0: i32) -> (i32, i32) {
    %c0_i32 = arith.constant 0 : i32
    %c0_i32_0 = arith.constant 0 : i32
    %c0_i32_1 = arith.constant 0 : i32
    return %c0_i32, %c0_i32_0 : i32, i32
  }
  func.func @transform_3(%arg0: i32) -> (i32, i32) {
    %c0_i32 = arith.constant 0 : i32
    %c0_i32_0 = arith.constant 0 : i32
    %c0_i32_1 = arith.constant 0 : i32
    return %c0_i32, %c0_i32_0 : i32, i32
  }
  func.func @transform_4(%arg0: i32) -> (i32, i32) {
    %c0_i32 = arith.constant 0 : i32
    %c0_i32_0 = arith.constant 0 : i32
    %c0_i32_1 = arith.constant 0 : i32
    return %c0_i32, %c0_i32_0 : i32, i32
  }
  func.func @transform_5(%arg0: i32) -> (i32, i32) {
    %c0_i32 = arith.constant 0 : i32
    %c0_i32_0 = arith.constant 0 : i32
    %c0_i32_1 = arith.constant 0 : i32
    return %c0_i32, %c0_i32_0 : i32, i32
  }
  func.func @transform_6(%arg0: i32) -> (i32, i32) {
    %c0_i32 = arith.constant 0 : i32
    %c0_i32_0 = arith.constant 0 : i32
    %c0_i32_1 = arith.constant 0 : i32
    return %c0_i32, %c0_i32_0 : i32, i32
  }
  func.func @transform_7(%arg0: i32) -> (i32, i32) {
    %c0_i32 = arith.constant 0 : i32
    %c0_i32_0 = arith.constant 0 : i32
    %c0_i32_1 = arith.constant 0 : i32
    return %c0_i32, %c0_i32_0 : i32, i32
  }
  func.func @transform_8(%arg0: i32) -> (i32, i32) {
    %c0_i32 = arith.constant 0 : i32
    %c0_i32_0 = arith.constant 0 : i32
    %c0_i32_1 = arith.constant 0 : i32
    return %c0_i32, %c0_i32_0 : i32, i32
  }
  func.func @transform_9(%arg0: i32) -> (i32, i32) {
    %c0_i32 = arith.constant 0 : i32
    %c0_i32_0 = arith.constant 0 : i32
    %c0_i32_1 = arith.constant 0 : i32
    return %c0_i32, %c0_i32_0 : i32, i32
  }
  func.func @transform_10(%arg0: i32) -> (i32, i32) {
    %c0_i32 = arith.constant 0 : i32
    %c0_i32_0 = arith.constant 0 : i32
    %c0_i32_1 = arith.constant 0 : i32
    return %c0_i32, %c0_i32_0 : i32, i32
  }
  func.func @transform_11(%arg0: i32) -> (i32, i32) {
    %c0_i32 = arith.constant 0 : i32
    %c0_i32_0 = arith.constant 0 : i32
    %c0_i32_1 = arith.constant 0 : i32
    return %c0_i32, %c0_i32_0 : i32, i32
  }
  func.func @transform_12(%arg0: i32) -> (i32, i32) {
    %c0_i32 = arith.constant 0 : i32
    %c0_i32_0 = arith.constant 0 : i32
    %c0_i32_1 = arith.constant 0 : i32
    return %c0_i32, %c0_i32_0 : i32, i32
  }
  func.func @transform_13(%arg0: i32) -> (i32, i32) {
    %c0_i32 = arith.constant 0 : i32
    %c0_i32_0 = arith.constant 0 : i32
    return %arg0, %c0_i32 : i32, i32
  }
}

</mosaic_0001>

<bundles_post_ra>
// kernel: tpu_custom_call.1
= control target key start
LH: loop header
LB: loop body
LE: loop exit
PB: predicated region body
PF: predicated region fallthrough
CT: control target
= control target key end

     0   :  { %s2819_s0 = inlined_call_operand.hbm [shape: f32[128,128], index: 0, kind: input, shape index: {}]   ;;  %s2820_s1 = inlined_call_operand.hbm [shape: f32[128,128], index: 1, kind: input, shape index: {}]   ;;  %s2821_s2 = inlined_call_operand.vmem [shape: f32[1,128], index: 2, kind: input, shape index: {}]   ;;  %s2822_s3 = inlined_call_operand.hbm [shape: f32[128,128], index: 3, kind: input, shape index: {}]   ;;  %s2823_s4 = inlined_call_operand.vmem [shape: f32[1,128], index: 4, kind: input, shape index: {}]   ;;  %s2824_s5 = inlined_call_operand.hbm [shape: f32[128,128], index: 5, kind: input, shape index: {}]   ;;  %s2825_s6 = inlined_call_operand.vmem [shape: f32[1,128], index: 6, kind: input, shape index: {}]   ;;  %s2826_s7 = inlined_call_operand.hbm [shape: f32[128,128], index: 7, kind: input, shape index: {}]   ;;  %s2827_s8 = inlined_call_operand.vmem [shape: f32[1,128], index: 8, kind: input, shape index: {}]   ;;  %s2828_s9 = inlined_call_operand.hbm [shape: f32[256,128], index: 9, kind: input, shape index: {}]   ;;  %s2829_s10 = inlined_call_operand.vmem [shape: f32[1,128], index: 10, kind: input, shape index: {}]   ;;  %s2830_s11 = inlined_call_operand.hbm [shape: f32[128,128], index: 11, kind: input, shape index: {}]   ;;  %s2831_s12 = inlined_call_operand.vmem [shape: f32[1,128], index: 12, kind: input, shape index: {}]   ;;  %s2832_s13 = inlined_call_operand.hbm [shape: f32[128,128], index: 13, kind: output, shape index: {}]  }
   0x1   :  { %2838 = sst [smem:[#allocation20_spill]] %s2820_s1 }
   0x2   :  { %2839 = sst [smem:[#allocation21_spill]] %s2825_s6 }
   0x3   :  { %2840 = sst [smem:[#allocation22_spill]] %s2827_s8 }
   0x4   :  { %2841 = sst [smem:[#allocation23_spill]] %s2829_s10 }
   0x5   :  { %2842 = sst [smem:[#allocation24_spill]] %s2831_s12 }
   0x6   :  { %2843 = sst [smem:[#allocation25_spill]] %s2832_s13 }
   0x7   :  { %18 = vsyncpa [#allocation3], 0 }
   0x8   :  { %20 = vsyncpa [#allocation3 + $0x1], 0 }
   0x9   :  { %21 = vsyncpa [#allocation6], 0 }
   0xa   :  { %22 = vsyncpa [#allocation9], 0 }
   0xb   :  { %23 = vsyncpa [#allocation12], 0 }
   0xc   :  { %24 = vsyncpa [#allocation4], 0 }
   0xd   :  { %26 = vsyncpa [#allocation4 + $0x1], 0  ;;  %s2419_s25 = smov 0   ;;  %s2421_s26 = smov 0  }
   0xe   :  { %s2423_s27 = smov 0   ;;  %s2425_s28 = smov 0  }
   0xf LB: > { %s2337_s29 = smov [#allocation5]   ;;  %s2440_s14 = sadd.s32 4294967295, %s2335_s28   ;;  %s2335_s28 = sphi %s2425_s28, %s2872_s28   ;;  %s2331_s27 = sphi %s2423_s27, %s2871_s27   ;;  %s2327_s26 = sphi %s2421_s26, %s2870_s26   ;;  %s2323_s25 = sphi %s2419_s25, %s2869_s25  }
  0x10   : > { %s353_s30 = sshll.u32 %s2337_s29, 4  ;;  %p1389_p0 = scmp.ge.s32.totalorder %s2335_s28, 1  ;;  %s2445_s30 = int_to_ptr.vmem [resolvable:$true] %s353_s30 }
  0x11   : > { %p2834_p1 = scmp.eq.s32.totalorder %s2440_s14, 0  ;;  %p341_p2 = scmp.lt.s32.totalorder %s2335_s28, 5 }
  0x12   : > { %s2338_s16 = smov [#allocation8]   ;;  %s2339_s19 = smov [#allocation11]  }
  0x13   : > { %p2447_p3 = pnand %p1389_p0, %p341_p2  ;;  %s385_s17 = sshll.u32 %s2338_s16, 4  ;;  %s2459_s17 = int_to_ptr.vmem [resolvable:$true] %s385_s17 }
  0x14   : > { %s417_s20 = sshll.u32 %s2339_s19, 4  ;;  %s2846_s1 = sld [smem:[#allocation20_spill]]  ;;  %s2461_s20 = int_to_ptr.vmem [resolvable:$true] %s417_s20 }
  0x15   : > { %s2844_s15 = scalar_select %p2447_p3, 1, 0 }
  0x16   : > { %p1976_p4 = pneg %p2447_p3 }
  0x18   : > { %p2455_p5 = pnand %p1976_p4, %p2834_p1 }
  0x1a   : > { %s2059_s23 = scalar_lea.hbm %s2846_s1, 2048  ;;  %p2471_p7 = pneg %p2455_p5 }
  0x1b   : > { %p2060_p6 = scmp.ne.s32.totalorder %s2846_s1, %s2059_s23  ;;  %p2066_p10 = scmp.lt.u32.totalorder %s2059_s23, %s2846_s1 }
  0x1d   : > { %p2062_p8 = pnand %p2471_p7, %p2060_p6 }
  0x1f   : > { %p2063_p9 = pneg %p2062_p8 }
  0x21   : > { %p2068_p11 = pnand %p2066_p10, %p2063_p9 }
  0x23   : > { %2071 = shalt.err (!%p2068_p11)
}
  0x24   : > { %s2072_s21 = scalar_lea.vmem %s2445_s30, 2048  ;;  %p2080_p2 = scmp.lt.s32.totalorder %s2445_s30, %s2445_s30 }
  0x25   : > { %p2073_p12 = scmp.ne.s32.totalorder %s2445_s30, %s2072_s21  ;;  %p2081_p4 = scmp.lt.s32.totalorder %s2072_s21, %s2072_s21 }
  0x27   : > { %p2075_p13 = pnand %p2073_p12, %p2471_p7  ;;  %p2082_p6 = por %p2081_p4, %p2080_p2 }
  0x29   : > { %p2076_p0 = pneg %p2075_p13 }
  0x2b   : > { %p2083_p8 = pnand %p2082_p6, %p2076_p0 }
  0x2d   : > { %2086 = shalt.err (!%p2083_p8)
}
  0x2e   : > { %s2836_s22 = smov 128   ;;  %s2341_s13 = smov 8  }
  0x2f   : > { %1979 = dma.hbm_to_vmem [thread:$0]  (!%p2455_p5), %s2846_s1, 2048, %s2445_s30, [#allocation6], %s2836_s22, %s2836_s22, %s2341_s13  }
  0x30   : > { %s2087_s21 = scalar_lea.hbm %s2824_s5, 2048 }
  0x31   : > { %p2088_p9 = scmp.ne.s32.totalorder %s2824_s5, %s2087_s21  ;;  %p2094_p12 = scmp.lt.u32.totalorder %s2087_s21, %s2824_s5 }
  0x33   : > { %p2090_p10 = pnand %p2088_p9, %p2471_p7 }
  0x35   : > { %p2091_p11 = pneg %p2090_p10 }
  0x37   : > { %p2096_p13 = pnand %p2094_p12, %p2091_p11 }
  0x39   : > { %2099 = shalt.err (!%p2096_p13)
}
  0x3a   : > { %s2100_s30 = scalar_lea.vmem %s2459_s17, 2048  ;;  %p2108_p6 = scmp.lt.s32.totalorder %s2459_s17, %s2459_s17 }
  0x3b   : > { %p2101_p0 = scmp.ne.s32.totalorder %s2459_s17, %s2100_s30  ;;  %p2109_p8 = scmp.lt.s32.totalorder %s2100_s30, %s2100_s30 }
  0x3d   : > { %p2103_p2 = pnand %p2101_p0, %p2471_p7  ;;  %p2110_p9 = por %p2109_p8, %p2108_p6 }
  0x3f   : > { %p2104_p4 = pneg %p2103_p2 }
  0x41   : > { %p2111_p10 = pnand %p2110_p9, %p2104_p4 }
  0x43   : > { %2114 = shalt.err (!%p2111_p10)
}
  0x44   : > { %1985 = dma.hbm_to_vmem [thread:$0]  (!%p2455_p5), %s2824_s5, 2048, %s2459_s17, [#allocation9], %s2836_s22, %s2836_s22, %s2341_s13  }
  0x45   : > { %s2115_s23 = scalar_lea.hbm %s2828_s9, 4096 }
  0x46   : > { %p2116_p11 = scmp.ne.s32.totalorder %s2828_s9, %s2115_s23  ;;  %p2122_p0 = scmp.lt.u32.totalorder %s2115_s23, %s2828_s9 }
  0x48   : > { %p2118_p12 = pnand %p2116_p11, %p2471_p7 }
  0x4a   : > { %p2119_p13 = pneg %p2118_p12 }
  0x4c   : > { %p2124_p2 = pnand %p2122_p0, %p2119_p13 }
  0x4e   : > { %2127 = shalt.err (!%p2124_p2)
}
  0x4f   : > { %s2128_s17 = scalar_lea.vmem %s2461_s20, 4096  ;;  %p2136_p9 = scmp.lt.s32.totalorder %s2461_s20, %s2461_s20 }
  0x50   : > { %p2129_p4 = scmp.ne.s32.totalorder %s2461_s20, %s2128_s17  ;;  %p2137_p10 = scmp.lt.s32.totalorder %s2128_s17, %s2128_s17 }
  0x52   : > { %p2131_p6 = pnand %p2129_p4, %p2471_p7  ;;  %p2138_p11 = por %p2137_p10, %p2136_p9 }
  0x54   : > { %p2132_p8 = pneg %p2131_p6 }
  0x56   : > { %p2139_p12 = pnand %p2138_p11, %p2132_p8 }
  0x58   : > { %2142 = shalt.err (!%p2139_p12)
}
  0x59   : > { %1991 = dma.hbm_to_vmem [thread:$0]  (!%p2455_p5), %s2828_s9, 4096, %s2461_s20, [#allocation12], %s2836_s22, %s2836_s22, %s2341_s13  }
  0x5a   : > { %s2342_s8 = smov [#allocation7]   ;;  %s2343_s12 = smov [#allocation10]  }
  0x5b   : > { %s369_s10 = sshll.u32 %s2342_s8, 4  ;;  %s401_s23 = sshll.u32 %s2343_s12, 4  ;;  %s370_s10 = int_to_ptr.vmem [resolvable:$true] %s369_s10  ;;  %s402_s23 = int_to_ptr.vmem [resolvable:$true] %s401_s23 }
  0x5c   : > { %s2143_s19 = scalar_lea.hbm %s2822_s3, 2048 }
  0x5d   : > { %p2144_p13 = scmp.ne.s32.totalorder %s2822_s3, %s2143_s19  ;;  %p2150_p4 = scmp.lt.u32.totalorder %s2143_s19, %s2822_s3 }
  0x5f   : > { %p2146_p0 = pnand %p2144_p13, %p2471_p7 }
  0x61   : > { %p2147_p2 = pneg %p2146_p0 }
  0x63   : > { %p2152_p6 = pnand %p2150_p4, %p2147_p2 }
  0x65   : > { %2155 = shalt.err (!%p2152_p6)
}
  0x66   : > { %s2156_s20 = scalar_lea.vmem %s370_s10, 2048  ;;  %p2164_p11 = scmp.lt.s32.totalorder %s370_s10, %s370_s10 }
  0x67   : > { %p2157_p8 = scmp.ne.s32.totalorder %s370_s10, %s2156_s20  ;;  %p2165_p12 = scmp.lt.s32.totalorder %s2156_s20, %s2156_s20 }
  0x69   : > { %p2159_p9 = pnand %p2157_p8, %p2471_p7  ;;  %p2166_p1 = por %p2165_p12, %p2164_p11 }
  0x6b   : > { %p2160_p10 = pneg %p2159_p9 }
  0x6d   : > { %p2167_p3 = pnand %p2166_p1, %p2160_p10 }
  0x6f   : > { %2170 = shalt.err (!%p2167_p3)
}
  0x70   : > { %1982 = dma.hbm_to_vmem [thread:$0]  (!%p2455_p5), %s2822_s3, 2048, %s370_s10, [#allocation6], %s2836_s22, %s2836_s22, %s2341_s13  }
  0x71   : > { %s2171_s24 = scalar_lea.hbm %s2826_s7, 2048 }
  0x72   : > { %p2172_p1 = scmp.ne.s32.totalorder %s2826_s7, %s2171_s24  ;;  %p2178_p0 = scmp.lt.u32.totalorder %s2171_s24, %s2826_s7 }
  0x74   : > { %p2174_p3 = pnand %p2172_p1, %p2471_p7 }
  0x76   : > { %p2175_p13 = pneg %p2174_p3 }
  0x78   : > { %p2180_p2 = pnand %p2178_p0, %p2175_p13 }
  0x7a   : > { %2183 = shalt.err (!%p2180_p2)
}
  0x7b   : > { %s2184_s30 = scalar_lea.vmem %s402_s23, 2048  ;;  %p2192_p9 = scmp.lt.s32.totalorder %s402_s23, %s402_s23 }
  0x7c   : > { %p2185_p4 = scmp.ne.s32.totalorder %s402_s23, %s2184_s30  ;;  %p2193_p10 = scmp.lt.s32.totalorder %s2184_s30, %s2184_s30 }
  0x7e   : > { %p2187_p6 = pnand %p2185_p4, %p2471_p7  ;;  %p2194_p11 = por %p2193_p10, %p2192_p9 }
  0x80   : > { %p2188_p8 = pneg %p2187_p6 }
  0x82   : > { %p2195_p12 = pnand %p2194_p11, %p2188_p8 }
  0x84   : > { %2198 = shalt.err (!%p2195_p12)
}
  0x85   : > { %1988 = dma.hbm_to_vmem [thread:$0]  (!%p2455_p5), %s2826_s7, 2048, %s402_s23, [#allocation9], %s2836_s22, %s2836_s22, %s2341_s13  }
  0x86   : > { %s2344_s1 = smov [#allocation13]   ;;  %s2199_s24 = scalar_lea.hbm %s2830_s11, 2048 }
  0x87   : > { %s433_s6 = sshll.u32 %s2344_s1, 4  ;;  %p2200_p1 = scmp.ne.s32.totalorder %s2830_s11, %s2199_s24  ;;  %s434_s6 = int_to_ptr.vmem [resolvable:$true] %s433_s6 }
  0x88   : > { %p2206_p0 = scmp.lt.u32.totalorder %s2199_s24, %s2830_s11 }
  0x89   : > { %p2202_p3 = pnand %p2200_p1, %p2471_p7 }
  0x8b   : > { %p2203_p13 = pneg %p2202_p3 }
  0x8d   : > { %p2208_p2 = pnand %p2206_p0, %p2203_p13 }
  0x8f   : > { %2211 = shalt.err (!%p2208_p2)
}
  0x90   : > { %s2212_s23 = scalar_lea.vmem %s434_s6, 2048  ;;  %p2220_p9 = scmp.lt.s32.totalorder %s434_s6, %s434_s6 }
  0x91   : > { %p2213_p4 = scmp.ne.s32.totalorder %s434_s6, %s2212_s23  ;;  %p2221_p10 = scmp.lt.s32.totalorder %s2212_s23, %s2212_s23 }
  0x93   : > { %p2215_p6 = pnand %p2213_p4, %p2471_p7  ;;  %p2222_p11 = por %p2221_p10, %p2220_p9 }
  0x95   : > { %p2216_p8 = pneg %p2215_p6 }
  0x97   : > { %p2223_p12 = pnand %p2222_p11, %p2216_p8 }
  0x99   : > { %2226 = shalt.err (!%p2223_p12)
}
  0x9a   : > { %1994 = dma.hbm_to_vmem [thread:$0]  (!%p2455_p5), %s2830_s11, 2048, %s434_s6, [#allocation12], %s2836_s22, %s2836_s22, %s2341_s13  }
  0x9b   : > { %s1388_s18 = sadd.s32 4294967294, %s2335_s28   ;;  %s2612_s16 = sadd.s32 1, %s2335_s28  }
  0x9c   : > { %s36_s20 = ssub.s32 %s2335_s28, %s2612_s16  ;;  %s39_s1 = sadd.s32 1, %s2331_s27 }
  0x9d   : > { %p37_p7 = scmp.eq.s32.totalorder %s36_s20, 0  ;;  %p46_p1 = scmp.ne.s32.totalorder %s2331_s27, %s2327_s26 }
  0x9e   : > { %p47_p3 = scmp.eq.s32.totalorder %s2335_s28, 0  ;;  %p52_p13 = scmp.ne.s32.totalorder %s2327_s26, %s2323_s25 }
  0x9f   : > { %s2623_s8 = scalar_select %p37_p7, %s2331_s27, %s39_s1  }
  0xa0   : > { %p2625_p0 = por %p47_p3, %p46_p1  ;;  %p2849_p2 = scmp.eq.s32.totalorder %s2440_s14, 0 }
  0xa1   : > { %p328_p4 = scmp.eq.s32.totalorder %s2440_s14, 3  ;;  %p334_p6 = scmp.eq.s32.totalorder %s1388_s18, 3 }
  0xa2   : > { %p2631_p5 = por %p2849_p2, %p52_p13  ;;  %p2009_p8 = scmp.lt.s32.totalorder %s2335_s28, 4 }
  0xa3   : > { %s450_s24 = sand.u32 1, %s2331_s27   ;;  %p2638_p9 = por %p328_p4, %p46_p1 }
  0xa4   : > { %p2642_p10 = por %p334_p6, %p52_p13  ;;  %s1397_s21 = sshll.u32 %s450_s24, 5 }
  0xa5   : > { %s2851_s29 = scalar_select %p2638_p9, 1, 0 }
  0xa6   : > { %s2852_s19 = scalar_select %p2642_p10, 1, 0 }
  0xa7   : > { %s1420_s17 = sshll.u32 %s2335_s28, 9  ;;  %s454_s18 = scalar_lea.vmem [#allocation2], %s1397_s21 }
  0xa8   : > { %s2650_s10 = scalar_lea.hbm %s2819_s0, %s1420_s17  ;;  %s461_s20 = sshll.u32 %s454_s18, 4  ;;  %s2652_s20 = int_to_ptr.vmem [resolvable:$true] %s461_s20 }
  0xa9   : > { %p2656_p11 = pnand %p2009_p8, %p2625_p0  ;;  %s2660_s22 = scalar_lea.sflag [#allocation3], %s450_s24 }
  0xaa   : > { %s2227_s23 = scalar_lea.hbm %s2650_s10, 512  ;;  %s2232_s12 = scalar_lea.hbm %s2819_s0, 2048 }
  0xab   : > { %p2228_p12 = scmp.ne.s32.totalorder %s2650_s10, %s2227_s23  ;;  %p2229_p7 = pneg %p2656_p11 }
  0xac   : > { %p2233_p13 = scmp.lt.u32.totalorder %s2650_s10, %s2819_s0  ;;  %p2234_p0 = scmp.lt.u32.totalorder %s2232_s12, %s2227_s23 }
  0xad   : > { %p2230_p1 = pnand %p2229_p7, %p2228_p12  ;;  %p2236_p4 = scmp.lt.u32.totalorder %s2227_s23, %s2650_s10 }
  0xae   : > { %p2235_p2 = por %p2234_p0, %p2233_p13 }
  0xaf   : > { %p2231_p3 = pneg %p2230_p1 }
  0xb0   : > { %p2237_p6 = por %p2236_p4, %p2235_p2 }
  0xb2   : > { %p2238_p8 = pnand %p2237_p6, %p2231_p3 }
  0xb4   : > { %2241 = shalt.err (!%p2238_p8)
}
  0xb5   : > { %s2242_s24 = scalar_lea.vmem %s2652_s20, 512  ;;  %s2345_s21 = smov [#allocation2]  }
  0xb6   : > { %p2243_p12 = scmp.ne.s32.totalorder %s2652_s20, %s2242_s24  ;;  %s2247_s17 = sshll.u32 %s2345_s21, 4  ;;  %s2248_s17 = int_to_ptr.vmem [resolvable:$false] %s2247_s17 }
  0xb7   : > { %s2249_s30 = scalar_lea.vmem %s2248_s17, 1024  ;;  %p2250_p9 = scmp.lt.s32.totalorder %s2652_s20, %s2248_s17 }
  0xb8   : > { %p2245_p1 = pnand %p2243_p12, %p2229_p7  ;;  %p2251_p13 = scmp.lt.s32.totalorder %s2249_s30, %s2242_s24 }
  0xba   : > { %p2246_p10 = pneg %p2245_p1  ;;  %p2252_p0 = por %p2251_p13, %p2250_p9 }
  0xbc   : > { %p2253_p2 = pnand %p2252_p0, %p2246_p10 }
  0xbe   : > { %2256 = shalt.err (!%p2253_p2)
}
  0xbf   : > { %s2854_s23 = smov 128   ;;  %p2855_p7 = scmp.ne.s32.totalorder %s2844_s15, 0 }
  0xc0   : > { %1998 = dma.hbm_to_vmem [thread:$0]  (!%p2656_p11), %s2650_s10, 512, %s2652_s20, %s2660_s22, %s2854_s23, %s2854_s23, %s2341_s13  }
  0xc1   : > { %473 = sbr.rel (%p2855_p7) target bundleno = 1580 (0x62c), region = 72  ;;  %s2694_s12 = sand.u32 (!%p2855_p7), 1, %s2327_s26  }
  0xc2   : > { %s1401_s18 = sshll.u32 (!%p2855_p7), %s2694_s12, 5  ;;  %s476_s24 = scalar_lea.sflag (!%p2855_p7), [#allocation3], %s2694_s12 }
  0xc3   : > { %s2700_s1 = scalar_lea.vmem (!%p2855_p7), [#allocation2], %s1401_s18 }
  0xc8   : > { %2302 = dma.done.wait (%p2631_p5), %s476_s24, 512  }
  0xc9   : > { %2304 = vsyncadd (%p2631_p5), %s476_s24, 4294966784  ;;  %p2856_p9 = scmp.eq.s32.totalorder %s2440_s14, 0 }
  0xcb   : > { %2306 = dma.done.wait (%p2856_p9), [#allocation6], 4096   ;;  %p2857_p10 = pmov %p2856_p9 }
  0xcc   : > { %p2858_p11 = pmov %p2856_p9 }
  0xcd   : > { %2308 = vsyncadd (%p2857_p10), [#allocation6], 4294963200 }
  0xce   : > { %2310 = dma.done.wait (%p2858_p11), [#allocation9], 4096   ;;  %p2859_p3 = pmov %p2856_p9 }
  0xd0   : > { %2312 = vsyncadd (%p2859_p3), [#allocation9], 4294963200  ;;  %p2860_p4 = pmov %p2859_p3 }
  0xd1   : > { %p2861_p6 = pmov %p2859_p3 }
  0xd2   : > { %2314 = dma.done.wait (%p2860_p4), [#allocation12], 6144  }
  0xd3   : > { %2316 = vsyncadd (%p2861_p6), [#allocation12], 4294961152  ;;  %v552_v0 = vld [vmem:[#allocation5] sm:$0xff]  ;;  %v553_v1 = vld [vmem:[#allocation5 + $0x8] sm:$0xff]  ;;  %s2862_s21 = sld [smem:[#allocation21_spill]]  ;;  %s2863_s23 = sld [smem:[#allocation22_spill]] }
  0xd4   : > { %v554_v2 = vld [vmem:[#allocation5 + $0x10] sm:$0xff]  ;;  %v1756_v3 = vpack.c.bf16 %v553_v1, %v552_v0  ;;  %v555_v4 = vld [vmem:[#allocation5 + $0x18] sm:$0xff]  ;;  %v556_v6 = vld [vmem:[#allocation5 + $0x20] sm:$0xff]  ;;  %s2864_s15 = sld [smem:[#allocation23_spill]]  ;;  %s2865_s6 = sld [smem:[#allocation24_spill]] }
  0xd5   : > { %v1760_v5 = vpack.c.bf16 %v555_v4, %v554_v2  ;;  %v557_v7 = vld [vmem:[#allocation5 + $0x28] sm:$0xff]  ;;  %v548_v9 = vld [vmem:[%s2700_s1] sm:$0xff]  ;;  %v558_v10 = vld [vmem:[#allocation5 + $0x30] sm:$0xff]  ;;  %s545_s10 = scalar_lea.vmem [#allocation14], %s1401_s18  ;;  %s1245_s18 = scalar_lea.sflag [#allocation4], %s2694_s12 }
  0xd6   : > { %1757 = vmatprep.subr.bf16.mxu0 %v1756_v3  ;;  %v1764_v8 = vpack.c.bf16 %v557_v7, %v556_v6  ;;  %v559_v11 = vld [vmem:[#allocation5 + $0x38] sm:$0xff]  ;;  %1598 = vmatprep.mubr.f32.mxu0 %v548_v9  ;;  %v664_v12 = vld [vmem:[#allocation7] sm:$0xff]  ;;  %v665_v13 = vld [vmem:[#allocation7 + $0x8] sm:$0xff]  ;;  %s1258_s20 = sshll.u32 %s545_s10, 4  ;;  %p2867_p8 = scmp.ne.s32.totalorder %s2851_s29, 0  ;;  %s2771_s20 = int_to_ptr.vmem [resolvable:$true] %s1258_s20 }
  0xd7   : > { %1759 = vmatpush3.bf16.msra.mxu0 %v1756_v3  ;;  %v666_v14 = vld [vmem:[#allocation7 + $0x10] sm:$0xff]  ;;  %v667_v15 = vld [vmem:[#allocation7 + $0x18] sm:$0xff]  ;;  %v1788_v16 = vpack.c.bf16 %v665_v13, %v664_v12  ;;  %v1768_v18 = vpack.c.bf16 %v559_v11, %v558_v10  ;;  %v668_v19 = vld [vmem:[#allocation7 + $0x20] sm:$0xff] }
  0xd8   : > { %1761 = vmatprep.subr.bf16.mxu0 %v1760_v5  ;;  %v1792_v17 = vpack.c.bf16 %v667_v15, %v666_v14  ;;  %v669_v20 = vld [vmem:[#allocation7 + $0x28] sm:$0xff]  ;;  %v560_v21 = vld [vmem:[#allocation5 + $0x40] sm:$0xff]  ;;  %v670_v25 = vld [vmem:[#allocation7 + $0x30] sm:$0xff] }
  0xd9   : > { %v561_v22 = vld [vmem:[#allocation5 + $0x48] sm:$0xff]  ;;  %1789 = vmatprep.subr.bf16.mxu1 %v1788_v16  ;;  %v1796_v23 = vpack.c.bf16 %v669_v20, %v668_v19  ;;  %v671_v26 = vld [vmem:[#allocation7 + $0x38] sm:$0xff]  ;;  %v562_v27 = vld [vmem:[#allocation5 + $0x50] sm:$0xff] }
  0xda   : > { %1791 = vmatpush3.bf16.msra.mxu1 %v1788_v16  ;;  %v1772_v24 = vpack.c.bf16 %v561_v22, %v560_v21  ;;  %v563_v28 = vld [vmem:[#allocation5 + $0x58] sm:$0xff]  ;;  %v1800_v29 = vpack.c.bf16 %v671_v26, %v670_v25  ;;  %v672_v31 = vld [vmem:[#allocation7 + $0x40] sm:$0xff]  ;;  %v673_v32 = vld [vmem:[#allocation7 + $0x48] sm:$0xff] }
  0xdb   : > { %1763 = vmatpush3.bf16.msra.mxu0 %v1760_v5  ;;  %1793 = vmatprep.subr.bf16.mxu1 %v1792_v17  ;;  %v1776_v30 = vpack.c.bf16 %v563_v28, %v562_v27  ;;  %v564_v33 = vld [vmem:[#allocation5 + $0x60] sm:$0xff]  ;;  %v565_v34 = vld [vmem:[#allocation5 + $0x68] sm:$0xff]  ;;  %v1804_v35 = vpack.c.bf16 %v673_v32, %v672_v31  ;;  %v674_v37 = vld [vmem:[#allocation7 + $0x50] sm:$0xff] }
  0xdc   : > { %1765 = vmatprep.subr.bf16.mxu0 %v1764_v8  ;;  %v1780_v36 = vpack.c.bf16 %v565_v34, %v564_v33  ;;  %v675_v38 = vld [vmem:[#allocation7 + $0x58] sm:$0xff]  ;;  %v566_v39 = vld [vmem:[#allocation5 + $0x70] sm:$0xff]  ;;  %v676_v43 = vld [vmem:[#allocation7 + $0x60] sm:$0xff] }
  0xdd   : > { %v567_v40 = vld [vmem:[#allocation5 + $0x78] sm:$0xff]  ;;  %v1808_v41 = vpack.c.bf16 %v675_v38, %v674_v37  ;;  %v677_v44 = vld [vmem:[#allocation7 + $0x68] sm:$0xff]  ;;  %v550_v47 = vld [vmem:[%s2700_s1 + $0x10] sm:$0xff] }
  0xde   : > { %1795 = vmatpush3.bf16.msra.mxu1 %v1792_v17  ;;  %v1784_v42 = vpack.c.bf16 %v567_v40, %v566_v39  ;;  %v1812_v45 = vpack.c.bf16 %v677_v44, %v676_v43  ;;  %v549_v46 = vld [vmem:[%s2700_s1 + $0x8] sm:$0xff]  ;;  %v551_v48 = vld [vmem:[%s2700_s1 + $0x18] sm:$0xff]  ;;  %v678_v49 = vld [vmem:[#allocation7 + $0x70] sm:$0xff]  ;;  %s2257_s1 = scalar_lea.vmem %s2771_s20, 512 }
  0xdf   : > { %1767 = vmatpush3.bf16.msra.mxu0 %v1764_v8  ;;  %1797 = vmatprep.subr.bf16.mxu1 %v1796_v23  ;;  %v679_v50 = vld [vmem:[#allocation7 + $0x78] sm:$0xff]  ;;  %v776_v52 = vld [vmem:[#allocation8] sm:$0xff]  ;;  %v777_v53 = vld [vmem:[#allocation8 + $0x8] sm:$0xff]  ;;  %p2258_p5 = scmp.ne.s32.totalorder %s2771_s20, %s2257_s1 }
  0xe0   : > { %1769 = vmatprep.subr.bf16.mxu0 %v1768_v18  ;;  %v1816_v51 = vpack.c.bf16 %v679_v50, %v678_v49  ;;  %v778_v54 = vld [vmem:[#allocation8 + $0x10] sm:$0xff]  ;;  %v1820_v55 = vpack.c.bf16 %v777_v53, %v776_v52  ;;  %v779_v56 = vld [vmem:[#allocation8 + $0x18] sm:$0xff]  ;;  %v780_v58 = vld [vmem:[#allocation8 + $0x20] sm:$0xff] }
  0xe1   : > { %v1824_v57 = vpack.c.bf16 %v779_v56, %v778_v54  ;;  %v781_v59 = vld [vmem:[#allocation8 + $0x28] sm:$0xff]  ;;  %v782_v61 = vld [vmem:[#allocation8 + $0x30] sm:$0xff]  ;;  %v783_v62 = vld [vmem:[#allocation8 + $0x38] sm:$0xff]  ;;  %p2259_p12 = pnand %p2258_p5, %p2867_p8 }
  0xe2   : > { %1799 = vmatpush3.bf16.msra.mxu1 %v1796_v23  ;;  %v1828_v60 = vpack.c.bf16 %v781_v59, %v780_v58  ;;  %v1832_v63 = vpack.c.bf16 %v783_v62, %v782_v61  ;;  %v784_v0 = vld [vmem:[#allocation8 + $0x40] sm:$0xff]  ;;  %v785_v1 = vld [vmem:[#allocation8 + $0x48] sm:$0xff]  ;;  %v786_v3 = vld [vmem:[#allocation8 + $0x50] sm:$0xff] }
  0xe3   : > { %1771 = vmatpush3.bf16.msra.mxu0 %v1768_v18  ;;  %1801 = vmatprep.subr.bf16.mxu1 %v1800_v29  ;;  %v1836_v2 = vpack.c.bf16 %v785_v1, %v784_v0  ;;  %v787_v4 = vld [vmem:[#allocation8 + $0x58] sm:$0xff]  ;;  %v788_v6 = vld [vmem:[#allocation8 + $0x60] sm:$0xff]  ;;  %v789_v7 = vld [vmem:[#allocation8 + $0x68] sm:$0xff]  ;;  %p2260_p1 = pneg %p2259_p12 }
  0xe4   : > { %1773 = vmatprep.subr.bf16.mxu0 %v1772_v24  ;;  %v1840_v5 = vpack.c.bf16 %v787_v4, %v786_v3  ;;  %v1844_v8 = vpack.c.bf16 %v789_v7, %v788_v6  ;;  %v1409_v9 = vld [vmem:[%s2821_s2] ss:$0 sm:$0xff]  ;;  %v790_v22 = vld [vmem:[#allocation8 + $0x70] sm:$0xff]  ;;  %v791_v23 = vld [vmem:[#allocation8 + $0x78] sm:$0xff] }
  0xe5   : > { %v892_v25 = vld [vmem:[#allocation10] sm:$0xff]  ;;  %v893_v26 = vld [vmem:[#allocation10 + $0x8] sm:$0xff]  ;;  %v894_v27 = vld [vmem:[#allocation10 + $0x10] sm:$0xff] }
  0xe6   : > { %1803 = vmatpush3.bf16.msra.mxu1 %v1800_v29  ;;  %v1852_v28 = vpack.c.bf16 %v893_v26, %v892_v25  ;;  %v895_v29 = vld [vmem:[#allocation10 + $0x18] sm:$0xff]  ;;  %v896_v31 = vld [vmem:[#allocation10 + $0x20] sm:$0xff]  ;;  %v897_v32 = vld [vmem:[#allocation10 + $0x28] sm:$0xff] }
  0xe7   : > { %1775 = vmatpush3.bf16.msra.mxu0 %v1772_v24  ;;  %1805 = vmatprep.subr.bf16.mxu1 %v1804_v35  ;;  %v1848_v24 = vpack.c.bf16 %v791_v23, %v790_v22  ;;  %v1860_v33 = vpack.c.bf16 %v897_v32, %v896_v31  ;;  %v898_v34 = vld [vmem:[#allocation10 + $0x30] sm:$0xff]  ;;  %v900_v37 = vld [vmem:[#allocation10 + $0x40] sm:$0xff]  ;;  %v901_v38 = vld [vmem:[#allocation10 + $0x48] sm:$0xff] }
  0xe8   : > { %1777 = vmatprep.subr.bf16.mxu0 %v1776_v30  ;;  %v1868_v39 = vpack.c.bf16 %v901_v38, %v900_v37  ;;  %v902_v40 = vld [vmem:[#allocation10 + $0x50] sm:$0xff]  ;;  %v1410_v43 = vld [vmem:[%s2823_s4] ss:$0 sm:$0xff]  ;;  %v1023_v4 = vld [vmem:[#allocation11 + $0x98] sm:$0xff] }
  0xe9   : > { %v904_v56 = vld [vmem:[#allocation10 + $0x60] sm:$0xff]  ;;  %v906_v59 = vld [vmem:[#allocation10 + $0x70] sm:$0xff]  ;;  %v1009_v22 = vld [vmem:[#allocation11 + $0x28] sm:$0xff] }
  0xea   : > { %1807 = vmatpush3.bf16.msra.mxu1 %v1804_v35  ;;  %v899_v35 = vld [vmem:[#allocation10 + $0x38] sm:$0xff]  ;;  %v1020_v62 = vld [vmem:[#allocation11 + $0x80] sm:$0xff]  ;;  %v1022_v3 = vld [vmem:[#allocation11 + $0x90] sm:$0xff] }
  0xeb   : > { %1779 = vmatpush3.bf16.msra.mxu0 %v1776_v30  ;;  %1809 = vmatprep.subr.bf16.mxu1 %v1808_v41  ;;  %v1856_v30 = vpack.c.bf16 %v895_v29, %v894_v27  ;;  %v1004_v0 = vld [vmem:[#allocation11] sm:$0xff]  ;;  %v1888_v6 = vpack.c.bf16 %v1023_v4, %v1022_v3  ;;  %v1006_v7 = vld [vmem:[#allocation11 + $0x10] sm:$0xff] }
  0xec   : > { %1781 = vmatprep.subr.bf16.mxu0 %v1780_v36  ;;  %v1026_v23 = vld [vmem:[#allocation11 + $0xb0] sm:$0xff]  ;;  %v1028_v29 = vld [vmem:[#allocation11 + $0xc0] sm:$0xff] }
  0xed   : > { %v1010_v27 = vld [vmem:[#allocation11 + $0x30] sm:$0xff] }
  0xee   : > { %1811 = vmatpush3.bf16.msra.mxu1 %v1808_v41  ;;  %v903_v41 = vld [vmem:[#allocation10 + $0x58] sm:$0xff]  ;;  %v1134_v3 = vld [vmem:[#allocation13 + $0x10] sm:$0xff] }
  0xef   : > { %1783 = vmatpush3.bf16.msra.mxu0 %v1780_v36  ;;  %1813 = vmatprep.subr.bf16.mxu1 %v1812_v45  ;;  %v1864_v36 = vpack.c.bf16 %v899_v35, %v898_v34  ;;  %v1013_v34 = vld [vmem:[#allocation11 + $0x48] sm:$0xff]  ;;  %v1030_v35 = vld [vmem:[#allocation11 + $0xd0] sm:$0xff] }
  0xf0   : > { %1785 = vmatprep.subr.bf16.mxu0 %v1784_v42 }
  0xf2   : > { %1815 = vmatpush3.bf16.msra.mxu1 %v1812_v45 }
  0xf3   : > { %1787 = vmatpush3.bf16.msra.mxu0 %v1784_v42  ;;  %1817 = vmatprep.subr.bf16.mxu1 %v1816_v51  ;;  %v1872_v42 = vpack.c.bf16 %v903_v41, %v902_v40  ;;  %v1015_v40 = vld [vmem:[#allocation11 + $0x58] sm:$0xff]  ;;  %v1032_v41 = vld [vmem:[#allocation11 + $0xe0] sm:$0xff] }
  0xf4   : > { %1821 = vmatprep.subr.bf16.mxu0 %v1820_v55 }
  0xf6   : > { %1599 = vmatmul.mubr.f32.vlgmr.msra.gmra.mrb[0].mxu0 %v549_v46  ;;  %1819 = vmatpush3.bf16.msra.mxu1 %v1816_v51 }
  0xf7   : > { %1601 = vmatprep.mubr.f32.mxu0 %v550_v47  ;;  %1823 = vmatpush3.bf16.msra.mxu0 %v1820_v55 }
  0xf8   : > { %1825 = vmatprep.subr.bf16.mxu0 %v1824_v57  ;;  %1853 = vmatprep.subr.bf16.mxu1 %v1852_v28 }
  0xfa   : > { %1602 = vmatmul.mubr.f32.gmra.mrb[2].mxu0 %v551_v48 }
  0xfb   : > { %1827 = vmatpush3.bf16.msra.mxu0 %v1824_v57  ;;  %v905_v57 = vld [vmem:[#allocation10 + $0x68] sm:$0xff] }
  0xfc   : > { %1829 = vmatprep.subr.bf16.mxu0 %v1828_v60  ;;  %v1876_v58 = vpack.c.bf16 %v905_v57, %v904_v56 }
  0xff   : > { %1831 = vmatpush3.bf16.msra.mxu0 %v1828_v60  ;;  %v907_v60 = vld [vmem:[#allocation10 + $0x78] sm:$0xff] }
 0x100   : > { %1833 = vmatprep.subr.bf16.mxu0 %v1832_v63  ;;  %v1880_v61 = vpack.c.bf16 %v907_v60, %v906_v59 }
 0x103   : > { %1835 = vmatpush3.bf16.msra.mxu0 %v1832_v63  ;;  %v1021_v63 = vld [vmem:[#allocation11 + $0x88] sm:$0xff] }
 0x104   : > { %1837 = vmatprep.subr.bf16.mxu0 %v1836_v2  ;;  %v1884_v1 = vpack.c.bf16 %v1021_v63, %v1020_v62 }
 0x107   : > { %1839 = vmatpush3.bf16.msra.mxu0 %v1836_v2  ;;  %v1005_v2 = vld [vmem:[#allocation11 + $0x8] sm:$0xff] }
 0x108   : > { %1841 = vmatprep.subr.bf16.mxu0 %v1840_v5 }
 0x10b   : > { %1843 = vmatpush3.bf16.msra.mxu0 %v1840_v5  ;;  %v1886_v5 = vpack.c.bf16 %v1005_v2, %v1004_v0  ;;  %v1018_v0 = vld [vmem:[#allocation11 + $0x70] sm:$0xff] }
 0x10c   : > { %1845 = vmatprep.subr.bf16.mxu0 %v1844_v8 }
 0x10f   : > { %1847 = vmatpush3.bf16.msra.mxu0 %v1844_v8  ;;  %v1007_v8 = vld [vmem:[#allocation11 + $0x18] sm:$0xff] }
 0x110   : > { %1849 = vmatprep.subr.bf16.mxu0 %v1848_v24 }
 0x113   : > { %1851 = vmatpush3.bf16.msra.mxu0 %v1848_v24  ;;  %v1027_v24 = vld [vmem:[#allocation11 + $0xb8] sm:$0xff] }
 0x114   : > { %1885 = vmatprep.subr.bf16.mxu0 %v1884_v1  ;;  %v1896_v26 = vpack.c.bf16 %v1027_v24, %v1026_v23  ;;  %v1019_v1 = vld [vmem:[#allocation11 + $0x78] sm:$0xff] }
 0x115   : > { %v1914_v2 = vpack.c.bf16 %v1019_v1, %v1018_v0 }
 0x1c9   : > { %v1600_v10 = vpop.f32.mrb[0].mxu0 }
 0x1ca   : > { %v2725_v11 = vadd.f32 %v1600_v10, %v1409_v9  ;;  %v641_v12 = vpop.f32.mrb[1].mxu0  ;;  %v1025_v10 = vld [vmem:[#allocation11 + $0xa8] sm:$0xff] }
 0x1cb   : > { %v2727_v13 = vadd.f32 %v1409_v9, %v641_v12  ;;  %v1890_v12 = vpack.c.bf16 %v1007_v8, %v1006_v7  ;;  %v1138_v8 = vld [vmem:[#allocation13 + $0x30] sm:$0xff] }
 0x1cc   : > { %v661_v16 = vmax.f32 %v2725_v11, 0.0 }
 0x1cd   : > { %v660_v14 = vmax.f32 %v2727_v13, 0.0  ;;  %v1603_v15 = vpop.f32.mrb[2].mxu0  ;;  %v1034_v13 = vld [vmem:[#allocation11 + $0xf0] sm:$0xff] }
 0x1ce   : > { %v2731_v17 = vadd.f32 %v1603_v15, %v1409_v9  ;;  %v651_v18 = vpop.f32.mrb[3].mxu0 }
 0x1cf   : > { %v2733_v19 = vadd.f32 %v1409_v9, %v651_v18  ;;  %1636 = vmatprep.mubr.f32.mxu1 %v660_v14  ;;  %v1024_v9 = vld [vmem:[#allocation11 + $0xa0] sm:$0xff] }
 0x1d0   : > { %v663_v20 = vmax.f32 %v2731_v17, 0.0  ;;  %1637 = vmatmul.mubr.f32.vlgmr.msra.gmra.mrb[0].mxu1 %v661_v16  ;;  %v1892_v15 = vpack.c.bf16 %v1025_v10, %v1024_v9  ;;  %v1008_v18 = vld [vmem:[#allocation11 + $0x20] sm:$0xff]  ;;  %v1139_v9 = vld [vmem:[#allocation13 + $0x38] sm:$0xff] }
 0x1d1   : > { %v662_v21 = vmax.f32 %v2733_v19, 0.0  ;;  %1855 = vmatpush3.bf16.msra.mxu1 %v1852_v28  ;;  %v1894_v25 = vpack.c.bf16 %v1009_v22, %v1008_v18  ;;  %v1011_v28 = vld [vmem:[#allocation11 + $0x38] sm:$0xff]  ;;  %v1132_v17 = vld [vmem:[#allocation13] sm:$0xff]  ;;  %v1928_v10 = vpack.c.bf16 %v1139_v9, %v1138_v8 }
 0x1d2   : > { %1857 = vmatprep.subr.bf16.mxu1 %v1856_v30  ;;  %v1898_v31 = vpack.c.bf16 %v1011_v28, %v1010_v27  ;;  %v1412_v22 = vld [vmem:[%s2863_s23] ss:$0 sm:$0xff]  ;;  %s2866_s23 = sld [smem:[#allocation25_spill]] }
 0x1d3   : > { %1639 = vmatprep.mubr.f32.mxu1 %v662_v21 }
 0x1d4   : > { %1640 = vmatmul.mubr.f32.gmra.mrb[2].mxu1 %v663_v20 }
 0x1d5   : > { %1859 = vmatpush3.bf16.msra.mxu1 %v1856_v30  ;;  %v1029_v30 = vld [vmem:[#allocation11 + $0xc8] sm:$0xff] }
 0x1d6   : > { %1861 = vmatprep.subr.bf16.mxu1 %v1860_v33  ;;  %v1900_v32 = vpack.c.bf16 %v1029_v30, %v1028_v29 }
 0x1d9   : > { %1863 = vmatpush3.bf16.msra.mxu1 %v1860_v33  ;;  %v1012_v33 = vld [vmem:[#allocation11 + $0x40] sm:$0xff] }
 0x1da   : > { %1865 = vmatprep.subr.bf16.mxu1 %v1864_v36  ;;  %v1902_v37 = vpack.c.bf16 %v1013_v34, %v1012_v33 }
 0x1dd   : > { %1867 = vmatpush3.bf16.msra.mxu1 %v1864_v36  ;;  %v1031_v36 = vld [vmem:[#allocation11 + $0xd8] sm:$0xff] }
 0x1de   : > { %1869 = vmatprep.subr.bf16.mxu1 %v1868_v39  ;;  %v1904_v38 = vpack.c.bf16 %v1031_v36, %v1030_v35  ;;  %v1142_v35 = vld [vmem:[#allocation13 + $0x50] sm:$0xff]  ;;  %v1143_v36 = vld [vmem:[#allocation13 + $0x58] sm:$0xff] }
 0x1e1   : > { %1871 = vmatpush3.bf16.msra.mxu1 %v1868_v39  ;;  %v1014_v39 = vld [vmem:[#allocation11 + $0x50] sm:$0xff] }
 0x1e2   : > { %1873 = vmatprep.subr.bf16.mxu1 %v1872_v42 }
 0x1e5   : > { %1875 = vmatpush3.bf16.msra.mxu1 %v1872_v42  ;;  %v1033_v42 = vld [vmem:[#allocation11 + $0xe8] sm:$0xff] }
 0x1e6   : > { %1877 = vmatprep.subr.bf16.mxu1 %v1876_v58 }
 0x1e9   : > { %1879 = vmatpush3.bf16.msra.mxu1 %v1876_v58 }
 0x1ea   : > { %1881 = vmatprep.subr.bf16.mxu1 %v1880_v61 }
 0x1ed   : > { %1883 = vmatpush3.bf16.msra.mxu1 %v1880_v61 }
 0x2a3   : > { %v1638_v44 = vpop.f32.mrb[0].mxu1 }
 0x2a4   : > { %v759_v45 = vadd.f32 %v1638_v44, %v1410_v43  ;;  %v753_v46 = vpop.f32.mrb[1].mxu1  ;;  %v1908_v44 = vpack.c.bf16 %v1033_v42, %v1032_v41  ;;  %v1146_v41 = vld [vmem:[#allocation13 + $0x70] sm:$0xff]  ;;  %v1147_v42 = vld [vmem:[#allocation13 + $0x78] sm:$0xff] }
 0x2a5   : > { %v754_v47 = vadd.f32 %v1410_v43, %v753_v46  ;;  %v1017_v46 = vld [vmem:[#allocation11 + $0x68] sm:$0xff] }
 0x2a6   : > { %v773_v50 = vmax.f32 %v759_v45, 0.0  ;;  %v1016_v45 = vld [vmem:[#allocation11 + $0x60] sm:$0xff] }
 0x2a7   : > { %v772_v48 = vmax.f32 %v754_v47, 0.0  ;;  %v1641_v49 = vpop.f32.mrb[2].mxu1  ;;  %v1910_v47 = vpack.c.bf16 %v1017_v46, %v1016_v45  ;;  %v1413_v45 = vld [vmem:[%s2864_s15] ss:$0 sm:$0xff] }
 0x2a8   : > { %v769_v51 = vadd.f32 %v1641_v49, %v1410_v43  ;;  %v763_v52 = vpop.f32.mrb[3].mxu1 }
 0x2a9   : > { %v764_v53 = vadd.f32 %v1410_v43, %v763_v52  ;;  %1674 = vmatprep.mubr.f32.mxu0 %v772_v48  ;;  %v1906_v43 = vpack.c.bf16 %v1015_v40, %v1014_v39  ;;  %v1411_v48 = vld [vmem:[%s2862_s21] ss:$0 sm:$0xff]  ;;  %v1145_v39 = vld [vmem:[#allocation13 + $0x68] sm:$0xff]  ;;  %s1421_s21 = sshll.u32 %s2440_s14, 9  ;;  %s2346_s14 = smov [#allocation14]  }
 0x2aa   : > { %v775_v54 = vmax.f32 %v769_v51, 0.0  ;;  %1675 = vmatmul.mubr.f32.vlgmr.msra.gmra.mrb[4].mxu0 %v773_v50  ;;  %s2776_s24 = scalar_lea.hbm %s2866_s23, %s1421_s21  ;;  %s2261_s15 = sshll.u32 %s2346_s14, 4  ;;  %s2262_s15 = int_to_ptr.vmem [resolvable:$false] %s2261_s15 }
 0x2ab   : > { %v774_v55 = vmax.f32 %v764_v53, 0.0  ;;  %1887 = vmatpush3.bf16.msra.mxu0 %v1886_v5  ;;  %v1136_v5 = vld [vmem:[#allocation13 + $0x20] sm:$0xff]  ;;  %s2263_s22 = scalar_lea.vmem %s2262_s15, 1024  ;;  %p2264_p13 = scmp.lt.s32.totalorder %s2771_s20, %s2262_s15 }
 0x2ac   : > { %1889 = vmatprep.subr.bf16.mxu0 %v1888_v6  ;;  %v1137_v6 = vld [vmem:[#allocation13 + $0x28] sm:$0xff]  ;;  %p2265_p0 = scmp.lt.s32.totalorder %s2263_s22, %s2257_s1 }
 0x2ad   : > { %1677 = vmatprep.mubr.f32.mxu0 %v774_v55  ;;  %v1924_v7 = vpack.c.bf16 %v1137_v6, %v1136_v5 }
 0x2ae   : > { %1678 = vmatmul.mubr.f32.gmra.mrb[6].mxu0 %v775_v54  ;;  %p2266_p2 = por %p2265_p0, %p2264_p13 }
 0x2af   : > { %1891 = vmatpush3.bf16.msra.mxu0 %v1890_v12  ;;  %v1140_v12 = vld [vmem:[#allocation13 + $0x40] sm:$0xff] }
 0x2b0   : > { %1893 = vmatprep.subr.bf16.mxu0 %v1892_v15  ;;  %v1141_v15 = vld [vmem:[#allocation13 + $0x48] sm:$0xff]  ;;  %p2267_p7 = pnand %p2266_p2, %p2260_p1 }
 0x2b1   : > { %v1932_v18 = vpack.c.bf16 %v1141_v15, %v1140_v12 }
 0x2b3   : > { %1895 = vmatpush3.bf16.msra.mxu0 %v1894_v25 }
 0x2b4   : > { %1897 = vmatprep.subr.bf16.mxu0 %v1896_v26 }
 0x2b7   : > { %1899 = vmatpush3.bf16.msra.mxu0 %v1898_v31 }
 0x2b8   : > { %1901 = vmatprep.subr.bf16.mxu0 %v1900_v32 }
 0x2bb   : > { %1903 = vmatpush3.bf16.msra.mxu0 %v1902_v37  ;;  %v1936_v37 = vpack.c.bf16 %v1143_v36, %v1142_v35 }
 0x2bc   : > { %1905 = vmatprep.subr.bf16.mxu0 %v1904_v38  ;;  %v1144_v38 = vld [vmem:[#allocation13 + $0x60] sm:$0xff] }
 0x2bd   : > { %v1940_v40 = vpack.c.bf16 %v1145_v39, %v1144_v38 }
 0x2bf   : > { %1907 = vmatpush3.bf16.msra.mxu0 %v1906_v43  ;;  %v1944_v43 = vpack.c.bf16 %v1147_v42, %v1146_v41 }
 0x2c0   : > { %1909 = vmatprep.subr.bf16.mxu0 %v1908_v44 }
 0x2c3   : > { %1911 = vmatpush3.bf16.msra.mxu0 %v1910_v47 }
 0x37d   : > { %v1676_v49 = vpop.f32.mrb[4].mxu0 }
 0x37e   : > { %v871_v50 = vadd.f32 %v1676_v49, %v1411_v48  ;;  %v865_v51 = vpop.f32.mrb[5].mxu0 }
 0x37f   : > { %v866_v52 = vadd.f32 %v1411_v48, %v865_v51 }
 0x380   : > { %v885_v53 = vadd.f32 %v871_v50, %v661_v16 }
 0x381   : > { %v884_v54 = vadd.f32 %v866_v52, %v660_v14  ;;  %v1679_v55 = vpop.f32.mrb[6].mxu0  ;;  %v1035_v14 = vld [vmem:[#allocation11 + $0xf8] sm:$0xff] }
 0x382   : > { %v881_v56 = vadd.f32 %v1679_v55, %v1411_v48  ;;  %v875_v57 = vpop.f32.mrb[7].mxu0  ;;  %v889_v60 = vmax.f32 %v885_v53, 0.0  ;;  %v1912_v63 = vpack.c.bf16 %v1035_v14, %v1034_v13  ;;  %v1414_v13 = vld [vmem:[%s2865_s6] ss:$0 sm:$0xff] }
 0x383   : > { %v888_v58 = vmax.f32 %v884_v54, 0.0  ;;  %v876_v59 = vadd.f32 %v1411_v48, %v875_v57 }
 0x384   : > { %v887_v61 = vadd.f32 %v881_v56, %v663_v20  ;;  %1913 = vmatprep.subr.bf16.mxu0 %v1912_v63  ;;  %v1133_v20 = vld [vmem:[#allocation13 + $0x8] sm:$0xff] }
 0x385   : > { %v886_v62 = vadd.f32 %v876_v59, %v662_v21  ;;  %1712 = vmatprep.mubr.f32.mxu1 %v888_v58  ;;  %1107 = vmatprep.mubr.f32.mxu0 %v888_v58  ;;  %v1916_v19 = vpack.c.bf16 %v1133_v20, %v1132_v17  ;;  %v1135_v21 = vld [vmem:[#allocation13 + $0x18] sm:$0xff] }
 0x386   : > { %1713 = vmatmul.mubr.f32.vlgmr.msra.gmra.mrb[4].mxu1 %v889_v60  ;;  %v891_v16 = vmax.f32 %v887_v61, 0.0  ;;  %1915 = vmatpush3.bf16.msra.mxu0 %v1914_v2  ;;  %v1920_v4 = vpack.c.bf16 %v1135_v21, %v1134_v3 }
 0x387   : > { %v890_v11 = vmax.f32 %v886_v62, 0.0  ;;  %1917 = vmatprep.subr.bf16.mxu1 %v1916_v19 }
 0x388   : > { %1919 = vmatpush3.bf16.msra.mxu1 %v1916_v19 }
 0x389   : > { %1715 = vmatprep.mubr.f32.mxu1 %v890_v11  ;;  %1921 = vmatprep.subr.bf16.mxu1 %v1920_v4 }
 0x38a   : > { %1716 = vmatmul.mubr.f32.gmra.mrb[6].mxu1 %v891_v16 }
 0x38c   : > { %1923 = vmatpush3.bf16.msra.mxu1 %v1920_v4 }
 0x38d   : > { %1925 = vmatprep.subr.bf16.mxu1 %v1924_v7 }
 0x390   : > { %1927 = vmatpush3.bf16.msra.mxu1 %v1924_v7 }
 0x391   : > { %1929 = vmatprep.subr.bf16.mxu1 %v1928_v10 }
 0x394   : > { %1931 = vmatpush3.bf16.msra.mxu1 %v1928_v10 }
 0x395   : > { %1933 = vmatprep.subr.bf16.mxu1 %v1932_v18 }
 0x398   : > { %1935 = vmatpush3.bf16.msra.mxu1 %v1932_v18 }
 0x399   : > { %1937 = vmatprep.subr.bf16.mxu1 %v1936_v37 }
 0x39c   : > { %1939 = vmatpush3.bf16.msra.mxu1 %v1936_v37 }
 0x39d   : > { %1941 = vmatprep.subr.bf16.mxu1 %v1940_v40 }
 0x3a0   : > { %1943 = vmatpush3.bf16.msra.mxu1 %v1940_v40 }
 0x3a1   : > { %1945 = vmatprep.subr.bf16.mxu1 %v1944_v43 }
 0x3a4   : > { %1947 = vmatpush3.bf16.msra.mxu1 %v1944_v43 }
 0x459   : > { %v1714_v23 = vpop.f32.mrb[4].mxu1 }
 0x45a   : > { %v981_v24 = vpop.f32.mrb[5].mxu1  ;;  %v987_v26 = vadd.f32 %v1714_v23, %v1412_v22 }
 0x45b   : > { %v982_v25 = vadd.f32 %v1412_v22, %v981_v24 }
 0x45c   : > { %v1001_v30 = vmax.f32 %v987_v26, 0.0 }
 0x45d   : > { %v1000_v27 = vmax.f32 %v982_v25, 0.0  ;;  %v1717_v28 = vpop.f32.mrb[6].mxu1 }
 0x45e   : > { %v991_v29 = vpop.f32.mrb[7].mxu1  ;;  %v997_v32 = vadd.f32 %v1717_v28, %v1412_v22 }
 0x45f   : > { %1108 = vmatmul.mubr.f32.vlgmr.msra.gmra.mrb[8].mxu0 %v1000_v27  ;;  %v992_v31 = vadd.f32 %v1412_v22, %v991_v29 }
 0x460   : > { %1112 = vmatprep.mubr.f32.mxu0 %v889_v60  ;;  %v1003_v34 = vmax.f32 %v997_v32, 0.0 }
 0x461   : > { %v1002_v33 = vmax.f32 %v992_v31, 0.0 }
 0x463   : > { %1113 = vmatmul.mubr.f32.gmra.mrb[10].mxu0 %v1001_v30 }
 0x464   : > { %1117 = vmatprep.mubr.f32.mxu0 %v890_v11 }
 0x467   : > { %1118 = vmatmul.mubr.f32.gmra.mrb[12].mxu0 %v1002_v33 }
 0x468   : > { %1122 = vmatprep.mubr.f32.mxu0 %v891_v16 }
 0x46b   : > { %1123 = vmatmul.mubr.f32.gmra.mrb[14].mxu0 %v1003_v34 }
 0x532   : > { %v1534_v44 = vpop.f32.mrb[8].mxu0 }
 0x533   : > { %v1535_v46 = vpop.f32.mrb[9].mxu0 }
 0x534   : > { %v1536_v47 = vadd.f32 %v1535_v46, %v1534_v44 }
 0x536   : > { %v1110_v48 = vadd.f32 %v1536_v47, %v1413_v45  ;;  %v1537_v49 = vpop.f32.mrb[10].mxu0 }
 0x537   : > { %v1538_v50 = vpop.f32.mrb[11].mxu0 }
 0x538   : > { %v1128_v51 = vmax.f32 %v1110_v48, 0.0  ;;  %v1539_v52 = vadd.f32 %v1538_v50, %v1537_v49 }
 0x53a   : > { %v1115_v53 = vadd.f32 %v1539_v52, %v1413_v45  ;;  %v1540_v54 = vpop.f32.mrb[12].mxu0  ;;  %1750 = vmatprep.mubr.f32.mxu1 %v1128_v51 }
 0x53b   : > { %v1541_v55 = vpop.f32.mrb[13].mxu0 }
 0x53c   : > { %v1129_v56 = vmax.f32 %v1115_v53, 0.0  ;;  %v1542_v57 = vadd.f32 %v1541_v55, %v1540_v54 }
 0x53e   : > { %v1120_v58 = vadd.f32 %v1542_v57, %v1413_v45  ;;  %v1543_v59 = vpop.f32.mrb[14].mxu0  ;;  %1751 = vmatmul.mubr.f32.vlgmr.msra.gmra.mrb[8].mxu1 %v1129_v56 }
 0x53f   : > { %v1544_v60 = vpop.f32.mrb[15].mxu0 }
 0x540   : > { %v1130_v61 = vmax.f32 %v1120_v58, 0.0  ;;  %v1545_v62 = vadd.f32 %v1544_v60, %v1543_v59 }
 0x542   : > { %v1125_v11 = vadd.f32 %v1545_v62, %v1413_v45  ;;  %1753 = vmatprep.mubr.f32.mxu1 %v1130_v61 }
 0x544   : > { %v1131_v16 = vmax.f32 %v1125_v11, 0.0 }
 0x546   : > { %1754 = vmatmul.mubr.f32.gmra.mrb[10].mxu1 %v1131_v16 }
 0x611   : > { %v1752_v14 = vpop.f32.mrb[8].mxu1 }
 0x612   : > { %v1227_v63 = vadd.f32 %v1752_v14, %v1414_v13  ;;  %v1221_v0 = vpop.f32.mrb[9].mxu1 }
 0x613   : > { %v1222_v1 = vadd.f32 %v1414_v13, %v1221_v0 }
 0x614   : > { %1241 = vst [vmem:[%s545_s10 + $0x8] sm:$0xff] %v1227_v63 }
 0x615   : > { %1240 = vst [vmem:[%s545_s10] sm:$0xff] %v1222_v1 }
 0x619   : > { %v1755_v2 = vpop.f32.mrb[10].mxu1 }
 0x61a   : > { %v1237_v17 = vadd.f32 %v1755_v2, %v1414_v13  ;;  %v1231_v20 = vpop.f32.mrb[11].mxu1 }
 0x61b   : > { %v1232_v3 = vadd.f32 %v1414_v13, %v1231_v20 }
 0x61c   : > { %1243 = vst [vmem:[%s545_s10 + $0x18] sm:$0xff] %v1237_v17 }
 0x61d   : > { %1242 = vst [vmem:[%s545_s10 + $0x10] sm:$0xff] %v1232_v3 }
 0x61e   : > { %2270 = shalt.err (!%p2267_p7)
}
 0x61f   : > { %s2271_s13 = scalar_lea.hbm %s2776_s24, 512  ;;  %s2275_s21 = scalar_lea.hbm %s2866_s23, 2048 }
 0x620   : > { %p2272_p9 = scmp.ne.s32.totalorder %s2776_s24, %s2271_s13  ;;  %p2276_p3 = scmp.lt.u32.totalorder %s2776_s24, %s2866_s23 }
 0x621   : > { %p2277_p4 = scmp.lt.u32.totalorder %s2275_s21, %s2271_s13  ;;  %p2279_p5 = scmp.lt.u32.totalorder %s2271_s13, %s2776_s24 }
 0x622   : > { %p2273_p10 = pnand %p2272_p9, %p2867_p8 }
 0x623   : > { %p2278_p6 = por %p2277_p4, %p2276_p3 }
 0x624   : > { %p2274_p11 = pneg %p2273_p10 }
 0x625   : > { %p2280_p12 = por %p2279_p5, %p2278_p6 }
 0x627   : > { %p2281_p1 = pnand %p2280_p12, %p2274_p11 }
 0x629   : > { %2284 = shalt.err (!%p2281_p1)
}
 0x62a   : > { %s2347_s1 = smov 128   ;;  %s2348_s14 = smov 8  }
 0x62b   : > { %1974 = dma.vmem_to_hbm [thread:$0]  (%p2867_p8), %s2771_s20, 512, %s2776_s24, %s1245_s18, %s2347_s1, %s2347_s1, %s2348_s14  }
 0x62c PF: > { %p2016_p13 = scmp.ge.s32.totalorder %s2335_s28, 2  ;;  %s1273_s15 = sand.u32 1, %s2323_s25  }
 0x62d   : > { %p2868_p0 = scmp.ne.s32.totalorder %s2852_s19, 0  ;;  %s1274_s22 = scalar_lea.sflag [#allocation4], %s1273_s15 }
 0x62f   : > { %p2000_p2 = pnand %p2016_p13, %p2868_p0 }
 0x631   : > { %2318 = dma.done.wait (!%p2000_p2), %s1274_s22, 512  }
 0x632   : > { %2320 = vsyncadd (!%p2000_p2), %s1274_s22, 4294966784  ;;  %p29_p7 = scmp.ge.s32.totalorder %s2612_s16, 6   ;;  %s2869_s25 = smov %s2327_s26 }
 0x633   : > { %s2870_s26 = smov %s2331_s27  ;;  %s2871_s27 = smov %s2623_s8 }
 0x634   : > { %s2872_s28 = smov %s2612_s16  ;;  %31 = sbr.rel (!%p29_p7) target bundleno = 15 (0xf), region = 141 }
 0x63b   :  { %1279 = vsyncpa [#allocation3], 1 }
 0x63c   :  { %1281 = vsyncpa [#allocation3 + $0x1], 1 }
 0x63d   :  { %1282 = vsyncpa [#allocation6], 1 }
 0x63e   :  { %1283 = vsyncpa [#allocation9], 1 }
 0x63f   :  { %1284 = vsyncpa [#allocation12], 1 }
 0x640   :  { %1285 = vsyncpa [#allocation4], 1 }
 0x641   :  { %1287 = vsyncpa [#allocation4 + $0x1], 1 }

// kernel: tpu_custom_call.1
= control target key start
LH: loop header
LB: loop body
LE: loop exit
PB: predicated region body
PF: predicated region fallthrough
CT: control target
= control target key end

     0   :  { %s2819_s0 = inlined_call_operand.hbm [shape: f32[128,128], index: 0, kind: input, shape index: {}]   ;;  %s2820_s1 = inlined_call_operand.hbm [shape: f32[128,128], index: 1, kind: input, shape index: {}]   ;;  %s2821_s2 = inlined_call_operand.vmem [shape: f32[1,128], index: 2, kind: input, shape index: {}]   ;;  %s2822_s3 = inlined_call_operand.hbm [shape: f32[128,128], index: 3, kind: input, shape index: {}]   ;;  %s2823_s4 = inlined_call_operand.vmem [shape: f32[1,128], index: 4, kind: input, shape index: {}]   ;;  %s2824_s5 = inlined_call_operand.hbm [shape: f32[128,128], index: 5, kind: input, shape index: {}]   ;;  %s2825_s6 = inlined_call_operand.vmem [shape: f32[1,128], index: 6, kind: input, shape index: {}]   ;;  %s2826_s7 = inlined_call_operand.hbm [shape: f32[128,128], index: 7, kind: input, shape index: {}]   ;;  %s2827_s8 = inlined_call_operand.vmem [shape: f32[1,128], index: 8, kind: input, shape index: {}]   ;;  %s2828_s9 = inlined_call_operand.hbm [shape: f32[256,128], index: 9, kind: input, shape index: {}]   ;;  %s2829_s10 = inlined_call_operand.vmem [shape: f32[1,128], index: 10, kind: input, shape index: {}]   ;;  %s2830_s11 = inlined_call_operand.hbm [shape: f32[128,128], index: 11, kind: input, shape index: {}]   ;;  %s2831_s12 = inlined_call_operand.vmem [shape: f32[1,128], index: 12, kind: input, shape index: {}]   ;;  %s2832_s13 = inlined_call_operand.hbm [shape: f32[128,128], index: 13, kind: output, shape index: {}]  }
   0x1   :  { %2838 = sst [smem:[#allocation20_spill]] %s2820_s1 }
   0x2   :  { %2839 = sst [smem:[#allocation21_spill]] %s2825_s6 }
   0x3   :  { %2840 = sst [smem:[#allocation22_spill]] %s2827_s8 }
   0x4   :  { %2841 = sst [smem:[#allocation23_spill]] %s2829_s10 }
   0x5   :  { %2842 = sst [smem:[#allocation24_spill]] %s2831_s12 }
   0x6   :  { %2843 = sst [smem:[#allocation25_spill]] %s2832_s13 }
   0x7   :  { %18 = vsyncpa [#allocation3], 0 }
   0x8   :  { %20 = vsyncpa [#allocation3 + $0x1], 0 }
   0x9   :  { %21 = vsyncpa [#allocation6], 0 }
   0xa   :  { %22 = vsyncpa [#allocation9], 0 }
   0xb   :  { %23 = vsyncpa [#allocation12], 0 }
   0xc   :  { %24 = vsyncpa [#allocation4], 0 }
   0xd   :  { %26 = vsyncpa [#allocation4 + $0x1], 0  ;;  %s2419_s25 = smov 0   ;;  %s2421_s26 = smov 0  }
   0xe   :  { %s2423_s27 = smov 0   ;;  %s2425_s28 = smov 0  }
   0xf LB: > { %s2337_s29 = smov [#allocation5]   ;;  %s2440_s14 = sadd.s32 4294967295, %s2335_s28   ;;  %s2335_s28 = sphi %s2425_s28, %s2872_s28   ;;  %s2331_s27 = sphi %s2423_s27, %s2871_s27   ;;  %s2327_s26 = sphi %s2421_s26, %s2870_s26   ;;  %s2323_s25 = sphi %s2419_s25, %s2869_s25  }
  0x10   : > { %s353_s30 = sshll.u32 %s2337_s29, 4  ;;  %p1389_p0 = scmp.ge.s32.totalorder %s2335_s28, 1  ;;  %s2445_s30 = int_to_ptr.vmem [resolvable:$true] %s353_s30 }
  0x11   : > { %p2834_p1 = scmp.eq.s32.totalorder %s2440_s14, 0  ;;  %p341_p2 = scmp.lt.s32.totalorder %s2335_s28, 5 }
  0x12   : > { %s2338_s16 = smov [#allocation8]   ;;  %s2339_s19 = smov [#allocation11]  }
  0x13   : > { %p2447_p3 = pnand %p1389_p0, %p341_p2  ;;  %s385_s17 = sshll.u32 %s2338_s16, 4  ;;  %s2459_s17 = int_to_ptr.vmem [resolvable:$true] %s385_s17 }
  0x14   : > { %s417_s20 = sshll.u32 %s2339_s19, 4  ;;  %s2846_s1 = sld [smem:[#allocation20_spill]]  ;;  %s2461_s20 = int_to_ptr.vmem [resolvable:$true] %s417_s20 }
  0x15   : > { %s2844_s15 = scalar_select %p2447_p3, 1, 0 }
  0x16   : > { %p1976_p4 = pneg %p2447_p3 }
  0x18   : > { %p2455_p5 = pnand %p1976_p4, %p2834_p1 }
  0x1a   : > { %s2059_s23 = scalar_lea.hbm %s2846_s1, 2048  ;;  %p2471_p7 = pneg %p2455_p5 }
  0x1b   : > { %p2060_p6 = scmp.ne.s32.totalorder %s2846_s1, %s2059_s23  ;;  %p2066_p10 = scmp.lt.u32.totalorder %s2059_s23, %s2846_s1 }
  0x1d   : > { %p2062_p8 = pnand %p2471_p7, %p2060_p6 }
  0x1f   : > { %p2063_p9 = pneg %p2062_p8 }
  0x21   : > { %p2068_p11 = pnand %p2066_p10, %p2063_p9 }
  0x23   : > { %2071 = shalt.err (!%p2068_p11)
}
  0x24   : > { %s2072_s21 = scalar_lea.vmem %s2445_s30, 2048  ;;  %p2080_p2 = scmp.lt.s32.totalorder %s2445_s30, %s2445_s30 }
  0x25   : > { %p2073_p12 = scmp.ne.s32.totalorder %s2445_s30, %s2072_s21  ;;  %p2081_p4 = scmp.lt.s32.totalorder %s2072_s21, %s2072_s21 }
  0x27   : > { %p2075_p13 = pnand %p2073_p12, %p2471_p7  ;;  %p2082_p6 = por %p2081_p4, %p2080_p2 }
  0x29   : > { %p2076_p0 = pneg %p2075_p13 }
  0x2b   : > { %p2083_p8 = pnand %p2082_p6, %p2076_p0 }
  0x2d   : > { %2086 = shalt.err (!%p2083_p8)
}
  0x2e   : > { %s2836_s22 = smov 128   ;;  %s2341_s13 = smov 8  }
  0x2f   : > { %1979 = dma.hbm_to_vmem [thread:$0]  (!%p2455_p5), %s2846_s1, 2048, %s2445_s30, [#allocation6], %s2836_s22, %s2836_s22, %s2341_s13  }
  0x30   : > { %s2087_s21 = scalar_lea.hbm %s2824_s5, 2048 }
  0x31   : > { %p2088_p9 = scmp.ne.s32.totalorder %s2824_s5, %s2087_s21  ;;  %p2094_p12 = scmp.lt.u32.totalorder %s2087_s21, %s2824_s5 }
  0x33   : > { %p2090_p10 = pnand %p2088_p9, %p2471_p7 }
  0x35   : > { %p2091_p11 = pneg %p2090_p10 }
  0x37   : > { %p2096_p13 = pnand %p2094_p12, %p2091_p11 }
  0x39   : > { %2099 = shalt.err (!%p2096_p13)
}
  0x3a   : > { %s2100_s30 = scalar_lea.vmem %s2459_s17, 2048  ;;  %p2108_p6 = scmp.lt.s32.totalorder %s2459_s17, %s2459_s17 }
  0x3b   : > { %p2101_p0 = scmp.ne.s32.totalorder %s2459_s17, %s2100_s30  ;;  %p2109_p8 = scmp.lt.s32.totalorder %s2100_s30, %s2100_s30 }
  0x3d   : > { %p2103_p2 = pnand %p2101_p0, %p2471_p7  ;;  %p2110_p9 = por %p2109_p8, %p2108_p6 }
  0x3f   : > { %p2104_p4 = pneg %p2103_p2 }
  0x41   : > { %p2111_p10 = pnand %p2110_p9, %p2104_p4 }
  0x43   : > { %2114 = shalt.err (!%p2111_p10)
}
  0x44   : > { %1985 = dma.hbm_to_vmem [thread:$0]  (!%p2455_p5), %s2824_s5, 2048, %s2459_s17, [#allocation9], %s2836_s22, %s2836_s22, %s2341_s13  }
  0x45   : > { %s2115_s23 = scalar_lea.hbm %s2828_s9, 4096 }
  0x46   : > { %p2116_p11 = scmp.ne.s32.totalorder %s2828_s9, %s2115_s23  ;;  %p2122_p0 = scmp.lt.u32.totalorder %s2115_s23, %s2828_s9 }
  0x48   : > { %p2118_p12 = pnand %p2116_p11, %p2471_p7 }
  0x4a   : > { %p2119_p13 = pneg %p2118_p12 }
  0x4c   : > { %p2124_p2 = pnand %p2122_p0, %p2119_p13 }
  0x4e   : > { %2127 = shalt.err (!%p2124_p2)
}
  0x4f   : > { %s2128_s17 = scalar_lea.vmem %s2461_s20, 4096  ;;  %p2136_p9 = scmp.lt.s32.totalorder %s2461_s20, %s2461_s20 }
  0x50   : > { %p2129_p4 = scmp.ne.s32.totalorder %s2461_s20, %s2128_s17  ;;  %p2137_p10 = scmp.lt.s32.totalorder %s2128_s17, %s2128_s17 }
  0x52   : > { %p2131_p6 = pnand %p2129_p4, %p2471_p7  ;;  %p2138_p11 = por %p2137_p10, %p2136_p9 }
  0x54   : > { %p2132_p8 = pneg %p2131_p6 }
  0x56   : > { %p2139_p12 = pnand %p2138_p11, %p2132_p8 }
  0x58   : > { %2142 = shalt.err (!%p2139_p12)
}
  0x59   : > { %1991 = dma.hbm_to_vmem [thread:$0]  (!%p2455_p5), %s2828_s9, 4096, %s2461_s20, [#allocation12], %s2836_s22, %s2836_s22, %s2341_s13  }
  0x5a   : > { %s2342_s8 = smov [#allocation7]   ;;  %s2343_s12 = smov [#allocation10]  }
  0x5b   : > { %s369_s10 = sshll.u32 %s2342_s8, 4  ;;  %s401_s23 = sshll.u32 %s2343_s12, 4  ;;  %s370_s10 = int_to_ptr.vmem [resolvable:$true] %s369_s10  ;;  %s402_s23 = int_to_ptr.vmem [resolvable:$true] %s401_s23 }
  0x5c   : > { %s2143_s19 = scalar_lea.hbm %s2822_s3, 2048 }
  0x5d   : > { %p2144_p13 = scmp.ne.s32.totalorder %s2822_s3, %s2143_s19  ;;  %p2150_p4 = scmp.lt.u32.totalorder %s2143_s19, %s2822_s3 }
  0x5f   : > { %p2146_p0 = pnand %p2144_p13, %p2471_p7 }
  0x61   : > { %p2147_p2 = pneg %p2146_p0 }
  0x63   : > { %p2152_p6 = pnand %p2150_p4, %p2147_p2 }
  0x65   : > { %2155 = shalt.err (!%p2152_p6)
}
  0x66   : > { %s2156_s20 = scalar_lea.vmem %s370_s10, 2048  ;;  %p2164_p11 = scmp.lt.s32.totalorder %s370_s10, %s370_s10 }
  0x67   : > { %p2157_p8 = scmp.ne.s32.totalorder %s370_s10, %s2156_s20  ;;  %p2165_p12 = scmp.lt.s32.totalorder %s2156_s20, %s2156_s20 }
  0x69   : > { %p2159_p9 = pnand %p2157_p8, %p2471_p7  ;;  %p2166_p1 = por %p2165_p12, %p2164_p11 }
  0x6b   : > { %p2160_p10 = pneg %p2159_p9 }
  0x6d   : > { %p2167_p3 = pnand %p2166_p1, %p2160_p10 }
  0x6f   : > { %2170 = shalt.err (!%p2167_p3)
}
  0x70   : > { %1982 = dma.hbm_to_vmem [thread:$0]  (!%p2455_p5), %s2822_s3, 2048, %s370_s10, [#allocation6], %s2836_s22, %s2836_s22, %s2341_s13  }
  0x71   : > { %s2171_s24 = scalar_lea.hbm %s2826_s7, 2048 }
  0x72   : > { %p2172_p1 = scmp.ne.s32.totalorder %s2826_s7, %s2171_s24  ;;  %p2178_p0 = scmp.lt.u32.totalorder %s2171_s24, %s2826_s7 }
  0x74   : > { %p2174_p3 = pnand %p2172_p1, %p2471_p7 }
  0x76   : > { %p2175_p13 = pneg %p2174_p3 }
  0x78   : > { %p2180_p2 = pnand %p2178_p0, %p2175_p13 }
  0x7a   : > { %2183 = shalt.err (!%p2180_p2)
}
  0x7b   : > { %s2184_s30 = scalar_lea.vmem %s402_s23, 2048  ;;  %p2192_p9 = scmp.lt.s32.totalorder %s402_s23, %s402_s23 }
  0x7c   : > { %p2185_p4 = scmp.ne.s32.totalorder %s402_s23, %s2184_s30  ;;  %p2193_p10 = scmp.lt.s32.totalorder %s2184_s30, %s2184_s30 }
  0x7e   : > { %p2187_p6 = pnand %p2185_p4, %p2471_p7  ;;  %p2194_p11 = por %p2193_p10, %p2192_p9 }
  0x80   : > { %p2188_p8 = pneg %p2187_p6 }
  0x82   : > { %p2195_p12 = pnand %p2194_p11, %p2188_p8 }
  0x84   : > { %2198 = shalt.err (!%p2195_p12)
}
  0x85   : > { %1988 = dma.hbm_to_vmem [thread:$0]  (!%p2455_p5), %s2826_s7, 2048, %s402_s23, [#allocation9], %s2836_s22, %s2836_s22, %s2341_s13  }
  0x86   : > { %s2344_s1 = smov [#allocation13]   ;;  %s2199_s24 = scalar_lea.hbm %s2830_s11, 2048 }
  0x87   : > { %s433_s6 = sshll.u32 %s2344_s1, 4  ;;  %p2200_p1 = scmp.ne.s32.totalorder %s2830_s11, %s2199_s24  ;;  %s434_s6 = int_to_ptr.vmem [resolvable:$true] %s433_s6 }
  0x88   : > { %p2206_p0 = scmp.lt.u32.totalorder %s2199_s24, %s2830_s11 }
  0x89   : > { %p2202_p3 = pnand %p2200_p1, %p2471_p7 }
  0x8b   : > { %p2203_p13 = pneg %p2202_p3 }
  0x8d   : > { %p2208_p2 = pnand %p2206_p0, %p2203_p13 }
  0x8f   : > { %2211 = shalt.err (!%p2208_p2)
}
  0x90   : > { %s2212_s23 = scalar_lea.vmem %s434_s6, 2048  ;;  %p2220_p9 = scmp.lt.s32.totalorder %s434_s6, %s434_s6 }
  0x91   : > { %p2213_p4 = scmp.ne.s32.totalorder %s434_s6, %s2212_s23  ;;  %p2221_p10 = scmp.lt.s32.totalorder %s2212_s23, %s2212_s23 }
  0x93   : > { %p2215_p6 = pnand %p2213_p4, %p2471_p7  ;;  %p2222_p11 = por %p2221_p10, %p2220_p9 }
  0x95   : > { %p2216_p8 = pneg %p2215_p6 }
  0x97   : > { %p2223_p12 = pnand %p2222_p11, %p2216_p8 }
  0x99   : > { %2226 = shalt.err (!%p2223_p12)
}
  0x9a   : > { %1994 = dma.hbm_to_vmem [thread:$0]  (!%p2455_p5), %s2830_s11, 2048, %s434_s6, [#allocation12], %s2836_s22, %s2836_s22, %s2341_s13  }
  0x9b   : > { %s1388_s18 = sadd.s32 4294967294, %s2335_s28   ;;  %s2612_s16 = sadd.s32 1, %s2335_s28  }
  0x9c   : > { %s36_s20 = ssub.s32 %s2335_s28, %s2612_s16  ;;  %s39_s1 = sadd.s32 1, %s2331_s27 }
  0x9d   : > { %p37_p7 = scmp.eq.s32.totalorder %s36_s20, 0  ;;  %p46_p1 = scmp.ne.s32.totalorder %s2331_s27, %s2327_s26 }
  0x9e   : > { %p47_p3 = scmp.eq.s32.totalorder %s2335_s28, 0  ;;  %p52_p13 = scmp.ne.s32.totalorder %s2327_s26, %s2323_s25 }
  0x9f   : > { %s2623_s8 = scalar_select %p37_p7, %s2331_s27, %s39_s1  }
  0xa0   : > { %p2625_p0 = por %p47_p3, %p46_p1  ;;  %p2849_p2 = scmp.eq.s32.totalorder %s2440_s14, 0 }
  0xa1   : > { %p328_p4 = scmp.eq.s32.totalorder %s2440_s14, 3  ;;  %p334_p6 = scmp.eq.s32.totalorder %s1388_s18, 3 }
  0xa2   : > { %p2631_p5 = por %p2849_p2, %p52_p13  ;;  %p2009_p8 = scmp.lt.s32.totalorder %s2335_s28, 4 }
  0xa3   : > { %s450_s24 = sand.u32 1, %s2331_s27   ;;  %p2638_p9 = por %p328_p4, %p46_p1 }
  0xa4   : > { %p2642_p10 = por %p334_p6, %p52_p13  ;;  %s1397_s21 = sshll.u32 %s450_s24, 5 }
  0xa5   : > { %s2851_s29 = scalar_select %p2638_p9, 1, 0 }
  0xa6   : > { %s2852_s19 = scalar_select %p2642_p10, 1, 0 }
  0xa7   : > { %s1420_s17 = sshll.u32 %s2335_s28, 9  ;;  %s454_s18 = scalar_lea.vmem [#allocation2], %s1397_s21 }
  0xa8   : > { %s2650_s10 = scalar_lea.hbm %s2819_s0, %s1420_s17  ;;  %s461_s20 = sshll.u32 %s454_s18, 4  ;;  %s2652_s20 = int_to_ptr.vmem [resolvable:$true] %s461_s20 }
  0xa9   : > { %p2656_p11 = pnand %p2009_p8, %p2625_p0  ;;  %s2660_s22 = scalar_lea.sflag [#allocation3], %s450_s24 }
  0xaa   : > { %s2227_s23 = scalar_lea.hbm %s2650_s10, 512  ;;  %s2232_s12 = scalar_lea.hbm %s2819_s0, 2048 }
  0xab   : > { %p2228_p12 = scmp.ne.s32.totalorder %s2650_s10, %s2227_s23  ;;  %p2229_p7 = pneg %p2656_p11 }
  0xac   : > { %p2233_p13 = scmp.lt.u32.totalorder %s2650_s10, %s2819_s0  ;;  %p2234_p0 = scmp.lt.u32.totalorder %s2232_s12, %s2227_s23 }
  0xad   : > { %p2230_p1 = pnand %p2229_p7, %p2228_p12  ;;  %p2236_p4 = scmp.lt.u32.totalorder %s2227_s23, %s2650_s10 }
  0xae   : > { %p2235_p2 = por %p2234_p0, %p2233_p13 }
  0xaf   : > { %p2231_p3 = pneg %p2230_p1 }
  0xb0   : > { %p2237_p6 = por %p2236_p4, %p2235_p2 }
  0xb2   : > { %p2238_p8 = pnand %p2237_p6, %p2231_p3 }
  0xb4   : > { %2241 = shalt.err (!%p2238_p8)
}
  0xb5   : > { %s2242_s24 = scalar_lea.vmem %s2652_s20, 512  ;;  %s2345_s21 = smov [#allocation2]  }
  0xb6   : > { %p2243_p12 = scmp.ne.s32.totalorder %s2652_s20, %s2242_s24  ;;  %s2247_s17 = sshll.u32 %s2345_s21, 4  ;;  %s2248_s17 = int_to_ptr.vmem [resolvable:$false] %s2247_s17 }
  0xb7   : > { %s2249_s30 = scalar_lea.vmem %s2248_s17, 1024  ;;  %p2250_p9 = scmp.lt.s32.totalorder %s2652_s20, %s2248_s17 }
  0xb8   : > { %p2245_p1 = pnand %p2243_p12, %p2229_p7  ;;  %p2251_p13 = scmp.lt.s32.totalorder %s2249_s30, %s2242_s24 }
  0xba   : > { %p2246_p10 = pneg %p2245_p1  ;;  %p2252_p0 = por %p2251_p13, %p2250_p9 }
  0xbc   : > { %p2253_p2 = pnand %p2252_p0, %p2246_p10 }
  0xbe   : > { %2256 = shalt.err (!%p2253_p2)
}
  0xbf   : > { %s2854_s23 = smov 128   ;;  %p2855_p7 = scmp.ne.s32.totalorder %s2844_s15, 0 }
  0xc0   : > { %1998 = dma.hbm_to_vmem [thread:$0]  (!%p2656_p11), %s2650_s10, 512, %s2652_s20, %s2660_s22, %s2854_s23, %s2854_s23, %s2341_s13  }
  0xc1   : > { %473 = sbr.rel (%p2855_p7) target bundleno = 1580 (0x62c), region = 72  ;;  %s2694_s12 = sand.u32 (!%p2855_p7), 1, %s2327_s26  }
  0xc2   : > { %s1401_s18 = sshll.u32 (!%p2855_p7), %s2694_s12, 5  ;;  %s476_s24 = scalar_lea.sflag (!%p2855_p7), [#allocation3], %s2694_s12 }
  0xc3   : > { %s2700_s1 = scalar_lea.vmem (!%p2855_p7), [#allocation2], %s1401_s18 }
  0xc8   : > { %2302 = dma.done.wait (%p2631_p5), %s476_s24, 512  }
  0xc9   : > { %2304 = vsyncadd (%p2631_p5), %s476_s24, 4294966784  ;;  %p2856_p9 = scmp.eq.s32.totalorder %s2440_s14, 0 }
  0xcb   : > { %2306 = dma.done.wait (%p2856_p9), [#allocation6], 4096   ;;  %p2857_p10 = pmov %p2856_p9 }
  0xcc   : > { %p2858_p11 = pmov %p2856_p9 }
  0xcd   : > { %2308 = vsyncadd (%p2857_p10), [#allocation6], 4294963200 }
  0xce   : > { %2310 = dma.done.wait (%p2858_p11), [#allocation9], 4096   ;;  %p2859_p3 = pmov %p2856_p9 }
  0xd0   : > { %2312 = vsyncadd (%p2859_p3), [#allocation9], 4294963200  ;;  %p2860_p4 = pmov %p2859_p3 }
  0xd1   : > { %p2861_p6 = pmov %p2859_p3 }
  0xd2   : > { %2314 = dma.done.wait (%p2860_p4), [#allocation12], 6144  }
  0xd3   : > { %2316 = vsyncadd (%p2861_p6), [#allocation12], 4294961152  ;;  %v552_v0 = vld [vmem:[#allocation5] sm:$0xff]  ;;  %v553_v1 = vld [vmem:[#allocation5 + $0x8] sm:$0xff]  ;;  %s2862_s21 = sld [smem:[#allocation21_spill]]  ;;  %s2863_s23 = sld [smem:[#allocation22_spill]] }
  0xd4   : > { %v554_v2 = vld [vmem:[#allocation5 + $0x10] sm:$0xff]  ;;  %v1756_v3 = vpack.c.bf16 %v553_v1, %v552_v0  ;;  %v555_v4 = vld [vmem:[#allocation5 + $0x18] sm:$0xff]  ;;  %v556_v6 = vld [vmem:[#allocation5 + $0x20] sm:$0xff]  ;;  %s2864_s15 = sld [smem:[#allocation23_spill]]  ;;  %s2865_s6 = sld [smem:[#allocation24_spill]] }
  0xd5   : > { %v1760_v5 = vpack.c.bf16 %v555_v4, %v554_v2  ;;  %v557_v7 = vld [vmem:[#allocation5 + $0x28] sm:$0xff]  ;;  %v548_v9 = vld [vmem:[%s2700_s1] sm:$0xff]  ;;  %v558_v10 = vld [vmem:[#allocation5 + $0x30] sm:$0xff]  ;;  %s545_s10 = scalar_lea.vmem [#allocation14], %s1401_s18  ;;  %s1245_s18 = scalar_lea.sflag [#allocation4], %s2694_s12 }
  0xd6   : > { %1757 = vmatprep.subr.bf16.mxu0 %v1756_v3  ;;  %v1764_v8 = vpack.c.bf16 %v557_v7, %v556_v6  ;;  %v559_v11 = vld [vmem:[#allocation5 + $0x38] sm:$0xff]  ;;  %1598 = vmatprep.mubr.f32.mxu0 %v548_v9  ;;  %v664_v12 = vld [vmem:[#allocation7] sm:$0xff]  ;;  %v665_v13 = vld [vmem:[#allocation7 + $0x8] sm:$0xff]  ;;  %s1258_s20 = sshll.u32 %s545_s10, 4  ;;  %p2867_p8 = scmp.ne.s32.totalorder %s2851_s29, 0  ;;  %s2771_s20 = int_to_ptr.vmem [resolvable:$true] %s1258_s20 }
  0xd7   : > { %1759 = vmatpush3.bf16.msra.mxu0 %v1756_v3  ;;  %v666_v14 = vld [vmem:[#allocation7 + $0x10] sm:$0xff]  ;;  %v667_v15 = vld [vmem:[#allocation7 + $0x18] sm:$0xff]  ;;  %v1788_v16 = vpack.c.bf16 %v665_v13, %v664_v12  ;;  %v1768_v18 = vpack.c.bf16 %v559_v11, %v558_v10  ;;  %v668_v19 = vld [vmem:[#allocation7 + $0x20] sm:$0xff] }
  0xd8   : > { %1761 = vmatprep.subr.bf16.mxu0 %v1760_v5  ;;  %v1792_v17 = vpack.c.bf16 %v667_v15, %v666_v14  ;;  %v669_v20 = vld [vmem:[#allocation7 + $0x28] sm:$0xff]  ;;  %v560_v21 = vld [vmem:[#allocation5 + $0x40] sm:$0xff]  ;;  %v670_v25 = vld [vmem:[#allocation7 + $0x30] sm:$0xff] }
  0xd9   : > { %v561_v22 = vld [vmem:[#allocation5 + $0x48] sm:$0xff]  ;;  %1789 = vmatprep.subr.bf16.mxu1 %v1788_v16  ;;  %v1796_v23 = vpack.c.bf16 %v669_v20, %v668_v19  ;;  %v671_v26 = vld [vmem:[#allocation7 + $0x38] sm:$0xff]  ;;  %v562_v27 = vld [vmem:[#allocation5 + $0x50] sm:$0xff] }
  0xda   : > { %1791 = vmatpush3.bf16.msra.mxu1 %v1788_v16  ;;  %v1772_v24 = vpack.c.bf16 %v561_v22, %v560_v21  ;;  %v563_v28 = vld [vmem:[#allocation5 + $0x58] sm:$0xff]  ;;  %v1800_v29 = vpack.c.bf16 %v671_v26, %v670_v25  ;;  %v672_v31 = vld [vmem:[#allocation7 + $0x40] sm:$0xff]  ;;  %v673_v32 = vld [vmem:[#allocation7 + $0x48] sm:$0xff] }
  0xdb   : > { %1763 = vmatpush3.bf16.msra.mxu0 %v1760_v5  ;;  %1793 = vmatprep.subr.bf16.mxu1 %v1792_v17  ;;  %v1776_v30 = vpack.c.bf16 %v563_v28, %v562_v27  ;;  %v564_v33 = vld [vmem:[#allocation5 + $0x60] sm:$0xff]  ;;  %v565_v34 = vld [vmem:[#allocation5 + $0x68] sm:$0xff]  ;;  %v1804_v35 = vpack.c.bf16 %v673_v32, %v672_v31  ;;  %v674_v37 = vld [vmem:[#allocation7 + $0x50] sm:$0xff] }
  0xdc   : > { %1765 = vmatprep.subr.bf16.mxu0 %v1764_v8  ;;  %v1780_v36 = vpack.c.bf16 %v565_v34, %v564_v33  ;;  %v675_v38 = vld [vmem:[#allocation7 + $0x58] sm:$0xff]  ;;  %v566_v39 = vld [vmem:[#allocation5 + $0x70] sm:$0xff]  ;;  %v676_v43 = vld [vmem:[#allocation7 + $0x60] sm:$0xff] }
  0xdd   : > { %v567_v40 = vld [vmem:[#allocation5 + $0x78] sm:$0xff]  ;;  %v1808_v41 = vpack.c.bf16 %v675_v38, %v674_v37  ;;  %v677_v44 = vld [vmem:[#allocation7 + $0x68] sm:$0xff]  ;;  %v550_v47 = vld [vmem:[%s2700_s1 + $0x10] sm:$0xff] }
  0xde   : > { %1795 = vmatpush3.bf16.msra.mxu1 %v1792_v17  ;;  %v1784_v42 = vpack.c.bf16 %v567_v40, %v566_v39  ;;  %v1812_v45 = vpack.c.bf16 %v677_v44, %v676_v43  ;;  %v549_v46 = vld [vmem:[%s2700_s1 + $0x8] sm:$0xff]  ;;  %v551_v48 = vld [vmem:[%s2700_s1 + $0x18] sm:$0xff]  ;;  %v678_v49 = vld [vmem:[#allocation7 + $0x70] sm:$0xff]  ;;  %s2257_s1 = scalar_lea.vmem %s2771_s20, 512 }
  0xdf   : > { %1767 = vmatpush3.bf16.msra.mxu0 %v1764_v8  ;;  %1797 = vmatprep.subr.bf16.mxu1 %v1796_v23  ;;  %v679_v50 = vld [vmem:[#allocation7 + $0x78] sm:$0xff]  ;;  %v776_v52 = vld [vmem:[#allocation8] sm:$0xff]  ;;  %v777_v53 = vld [vmem:[#allocation8 + $0x8] sm:$0xff]  ;;  %p2258_p5 = scmp.ne.s32.totalorder %s2771_s20, %s2257_s1 }
  0xe0   : > { %1769 = vmatprep.subr.bf16.mxu0 %v1768_v18  ;;  %v1816_v51 = vpack.c.bf16 %v679_v50, %v678_v49  ;;  %v778_v54 = vld [vmem:[#allocation8 + $0x10] sm:$0xff]  ;;  %v1820_v55 = vpack.c.bf16 %v777_v53, %v776_v52  ;;  %v779_v56 = vld [vmem:[#allocation8 + $0x18] sm:$0xff]  ;;  %v780_v58 = vld [vmem:[#allocation8 + $0x20] sm:$0xff] }
  0xe1   : > { %v1824_v57 = vpack.c.bf16 %v779_v56, %v778_v54  ;;  %v781_v59 = vld [vmem:[#allocation8 + $0x28] sm:$0xff]  ;;  %v782_v61 = vld [vmem:[#allocation8 + $0x30] sm:$0xff]  ;;  %v783_v62 = vld [vmem:[#allocation8 + $0x38] sm:$0xff]  ;;  %p2259_p12 = pnand %p2258_p5, %p2867_p8 }
  0xe2   : > { %1799 = vmatpush3.bf16.msra.mxu1 %v1796_v23  ;;  %v1828_v60 = vpack.c.bf16 %v781_v59, %v780_v58  ;;  %v1832_v63 = vpack.c.bf16 %v783_v62, %v782_v61  ;;  %v784_v0 = vld [vmem:[#allocation8 + $0x40] sm:$0xff]  ;;  %v785_v1 = vld [vmem:[#allocation8 + $0x48] sm:$0xff]  ;;  %v786_v3 = vld [vmem:[#allocation8 + $0x50] sm:$0xff] }
  0xe3   : > { %1771 = vmatpush3.bf16.msra.mxu0 %v1768_v18  ;;  %1801 = vmatprep.subr.bf16.mxu1 %v1800_v29  ;;  %v1836_v2 = vpack.c.bf16 %v785_v1, %v784_v0  ;;  %v787_v4 = vld [vmem:[#allocation8 + $0x58] sm:$0xff]  ;;  %v788_v6 = vld [vmem:[#allocation8 + $0x60] sm:$0xff]  ;;  %v789_v7 = vld [vmem:[#allocation8 + $0x68] sm:$0xff]  ;;  %p2260_p1 = pneg %p2259_p12 }
  0xe4   : > { %1773 = vmatprep.subr.bf16.mxu0 %v1772_v24  ;;  %v1840_v5 = vpack.c.bf16 %v787_v4, %v786_v3  ;;  %v1844_v8 = vpack.c.bf16 %v789_v7, %v788_v6  ;;  %v1409_v9 = vld [vmem:[%s2821_s2] ss:$0 sm:$0xff]  ;;  %v790_v22 = vld [vmem:[#allocation8 + $0x70] sm:$0xff]  ;;  %v791_v23 = vld [vmem:[#allocation8 + $0x78] sm:$0xff] }
  0xe5   : > { %v892_v25 = vld [vmem:[#allocation10] sm:$0xff]  ;;  %v893_v26 = vld [vmem:[#allocation10 + $0x8] sm:$0xff]  ;;  %v894_v27 = vld [vmem:[#allocation10 + $0x10] sm:$0xff] }
  0xe6   : > { %1803 = vmatpush3.bf16.msra.mxu1 %v1800_v29  ;;  %v1852_v28 = vpack.c.bf16 %v893_v26, %v892_v25  ;;  %v895_v29 = vld [vmem:[#allocation10 + $0x18] sm:$0xff]  ;;  %v896_v31 = vld [vmem:[#allocation10 + $0x20] sm:$0xff]  ;;  %v897_v32 = vld [vmem:[#allocation10 + $0x28] sm:$0xff] }
  0xe7   : > { %1775 = vmatpush3.bf16.msra.mxu0 %v1772_v24  ;;  %1805 = vmatprep.subr.bf16.mxu1 %v1804_v35  ;;  %v1848_v24 = vpack.c.bf16 %v791_v23, %v790_v22  ;;  %v1860_v33 = vpack.c.bf16 %v897_v32, %v896_v31  ;;  %v898_v34 = vld [vmem:[#allocation10 + $0x30] sm:$0xff]  ;;  %v900_v37 = vld [vmem:[#allocation10 + $0x40] sm:$0xff]  ;;  %v901_v38 = vld [vmem:[#allocation10 + $0x48] sm:$0xff] }
  0xe8   : > { %1777 = vmatprep.subr.bf16.mxu0 %v1776_v30  ;;  %v1868_v39 = vpack.c.bf16 %v901_v38, %v900_v37  ;;  %v902_v40 = vld [vmem:[#allocation10 + $0x50] sm:$0xff]  ;;  %v1410_v43 = vld [vmem:[%s2823_s4] ss:$0 sm:$0xff]  ;;  %v1023_v4 = vld [vmem:[#allocation11 + $0x98] sm:$0xff] }
  0xe9   : > { %v904_v56 = vld [vmem:[#allocation10 + $0x60] sm:$0xff]  ;;  %v906_v59 = vld [vmem:[#allocation10 + $0x70] sm:$0xff]  ;;  %v1009_v22 = vld [vmem:[#allocation11 + $0x28] sm:$0xff] }
  0xea   : > { %1807 = vmatpush3.bf16.msra.mxu1 %v1804_v35  ;;  %v899_v35 = vld [vmem:[#allocation10 + $0x38] sm:$0xff]  ;;  %v1020_v62 = vld [vmem:[#allocation11 + $0x80] sm:$0xff]  ;;  %v1022_v3 = vld [vmem:[#allocation11 + $0x90] sm:$0xff] }
  0xeb   : > { %1779 = vmatpush3.bf16.msra.mxu0 %v1776_v30  ;;  %1809 = vmatprep.subr.bf16.mxu1 %v1808_v41  ;;  %v1856_v30 = vpack.c.bf16 %v895_v29, %v894_v27  ;;  %v1004_v0 = vld [vmem:[#allocation11] sm:$0xff]  ;;  %v1888_v6 = vpack.c.bf16 %v1023_v4, %v1022_v3  ;;  %v1006_v7 = vld [vmem:[#allocation11 + $0x10] sm:$0xff] }
  0xec   : > { %1781 = vmatprep.subr.bf16.mxu0 %v1780_v36  ;;  %v1026_v23 = vld [vmem:[#allocation11 + $0xb0] sm:$0xff]  ;;  %v1028_v29 = vld [vmem:[#allocation11 + $0xc0] sm:$0xff] }
  0xed   : > { %v1010_v27 = vld [vmem:[#allocation11 + $0x30] sm:$0xff] }
  0xee   : > { %1811 = vmatpush3.bf16.msra.mxu1 %v1808_v41  ;;  %v903_v41 = vld [vmem:[#allocation10 + $0x58] sm:$0xff]  ;;  %v1134_v3 = vld [vmem:[#allocation13 + $0x10] sm:$0xff] }
  0xef   : > { %1783 = vmatpush3.bf16.msra.mxu0 %v1780_v36  ;;  %1813 = vmatprep.subr.bf16.mxu1 %v1812_v45  ;;  %v1864_v36 = vpack.c.bf16 %v899_v35, %v898_v34  ;;  %v1013_v34 = vld [vmem:[#allocation11 + $0x48] sm:$0xff]  ;;  %v1030_v35 = vld [vmem:[#allocation11 + $0xd0] sm:$0xff] }
  0xf0   : > { %1785 = vmatprep.subr.bf16.mxu0 %v1784_v42 }
  0xf2   : > { %1815 = vmatpush3.bf16.msra.mxu1 %v1812_v45 }
  0xf3   : > { %1787 = vmatpush3.bf16.msra.mxu0 %v1784_v42  ;;  %1817 = vmatprep.subr.bf16.mxu1 %v1816_v51  ;;  %v1872_v42 = vpack.c.bf16 %v903_v41, %v902_v40  ;;  %v1015_v40 = vld [vmem:[#allocation11 + $0x58] sm:$0xff]  ;;  %v1032_v41 = vld [vmem:[#allocation11 + $0xe0] sm:$0xff] }
  0xf4   : > { %1821 = vmatprep.subr.bf16.mxu0 %v1820_v55 }
  0xf6   : > { %1599 = vmatmul.mubr.f32.vlgmr.msra.gmra.mrb[0].mxu0 %v549_v46  ;;  %1819 = vmatpush3.bf16.msra.mxu1 %v1816_v51 }
  0xf7   : > { %1601 = vmatprep.mubr.f32.mxu0 %v550_v47  ;;  %1823 = vmatpush3.bf16.msra.mxu0 %v1820_v55 }
  0xf8   : > { %1825 = vmatprep.subr.bf16.mxu0 %v1824_v57  ;;  %1853 = vmatprep.subr.bf16.mxu1 %v1852_v28 }
  0xfa   : > { %1602 = vmatmul.mubr.f32.gmra.mrb[2].mxu0 %v551_v48 }
  0xfb   : > { %1827 = vmatpush3.bf16.msra.mxu0 %v1824_v57  ;;  %v905_v57 = vld [vmem:[#allocation10 + $0x68] sm:$0xff] }
  0xfc   : > { %1829 = vmatprep.subr.bf16.mxu0 %v1828_v60  ;;  %v1876_v58 = vpack.c.bf16 %v905_v57, %v904_v56 }
  0xff   : > { %1831 = vmatpush3.bf16.msra.mxu0 %v1828_v60  ;;  %v907_v60 = vld [vmem:[#allocation10 + $0x78] sm:$0xff] }
 0x100   : > { %1833 = vmatprep.subr.bf16.mxu0 %v1832_v63  ;;  %v1880_v61 = vpack.c.bf16 %v907_v60, %v906_v59 }
 0x103   : > { %1835 = vmatpush3.bf16.msra.mxu0 %v1832_v63  ;;  %v1021_v63 = vld [vmem:[#allocation11 + $0x88] sm:$0xff] }
 0x104   : > { %1837 = vmatprep.subr.bf16.mxu0 %v1836_v2  ;;  %v1884_v1 = vpack.c.bf16 %v1021_v63, %v1020_v62 }
 0x107   : > { %1839 = vmatpush3.bf16.msra.mxu0 %v1836_v2  ;;  %v1005_v2 = vld [vmem:[#allocation11 + $0x8] sm:$0xff] }
 0x108   : > { %1841 = vmatprep.subr.bf16.mxu0 %v1840_v5 }
 0x10b   : > { %1843 = vmatpush3.bf16.msra.mxu0 %v1840_v5  ;;  %v1886_v5 = vpack.c.bf16 %v1005_v2, %v1004_v0  ;;  %v1018_v0 = vld [vmem:[#allocation11 + $0x70] sm:$0xff] }
 0x10c   : > { %1845 = vmatprep.subr.bf16.mxu0 %v1844_v8 }
 0x10f   : > { %1847 = vmatpush3.bf16.msra.mxu0 %v1844_v8  ;;  %v1007_v8 = vld [vmem:[#allocation11 + $0x18] sm:$0xff] }
 0x110   : > { %1849 = vmatprep.subr.bf16.mxu0 %v1848_v24 }
 0x113   : > { %1851 = vmatpush3.bf16.msra.mxu0 %v1848_v24  ;;  %v1027_v24 = vld [vmem:[#allocation11 + $0xb8] sm:$0xff] }
 0x114   : > { %1885 = vmatprep.subr.bf16.mxu0 %v1884_v1  ;;  %v1896_v26 = vpack.c.bf16 %v1027_v24, %v1026_v23  ;;  %v1019_v1 = vld [vmem:[#allocation11 + $0x78] sm:$0xff] }
 0x115   : > { %v1914_v2 = vpack.c.bf16 %v1019_v1, %v1018_v0 }
 0x1c9   : > { %v1600_v10 = vpop.f32.mrb[0].mxu0 }
 0x1ca   : > { %v2725_v11 = vadd.f32 %v1600_v10, %v1409_v9  ;;  %v641_v12 = vpop.f32.mrb[1].mxu0  ;;  %v1025_v10 = vld [vmem:[#allocation11 + $0xa8] sm:$0xff] }
 0x1cb   : > { %v2727_v13 = vadd.f32 %v1409_v9, %v641_v12  ;;  %v1890_v12 = vpack.c.bf16 %v1007_v8, %v1006_v7  ;;  %v1138_v8 = vld [vmem:[#allocation13 + $0x30] sm:$0xff] }
 0x1cc   : > { %v661_v16 = vmax.f32 %v2725_v11, 0.0 }
 0x1cd   : > { %v660_v14 = vmax.f32 %v2727_v13, 0.0  ;;  %v1603_v15 = vpop.f32.mrb[2].mxu0  ;;  %v1034_v13 = vld [vmem:[#allocation11 + $0xf0] sm:$0xff] }
 0x1ce   : > { %v2731_v17 = vadd.f32 %v1603_v15, %v1409_v9  ;;  %v651_v18 = vpop.f32.mrb[3].mxu0 }
 0x1cf   : > { %v2733_v19 = vadd.f32 %v1409_v9, %v651_v18  ;;  %1636 = vmatprep.mubr.f32.mxu1 %v660_v14  ;;  %v1024_v9 = vld [vmem:[#allocation11 + $0xa0] sm:$0xff] }
 0x1d0   : > { %v663_v20 = vmax.f32 %v2731_v17, 0.0  ;;  %1637 = vmatmul.mubr.f32.vlgmr.msra.gmra.mrb[0].mxu1 %v661_v16  ;;  %v1892_v15 = vpack.c.bf16 %v1025_v10, %v1024_v9  ;;  %v1008_v18 = vld [vmem:[#allocation11 + $0x20] sm:$0xff]  ;;  %v1139_v9 = vld [vmem:[#allocation13 + $0x38] sm:$0xff] }
 0x1d1   : > { %v662_v21 = vmax.f32 %v2733_v19, 0.0  ;;  %1855 = vmatpush3.bf16.msra.mxu1 %v1852_v28  ;;  %v1894_v25 = vpack.c.bf16 %v1009_v22, %v1008_v18  ;;  %v1011_v28 = vld [vmem:[#allocation11 + $0x38] sm:$0xff]  ;;  %v1132_v17 = vld [vmem:[#allocation13] sm:$0xff]  ;;  %v1928_v10 = vpack.c.bf16 %v1139_v9, %v1138_v8 }
 0x1d2   : > { %1857 = vmatprep.subr.bf16.mxu1 %v1856_v30  ;;  %v1898_v31 = vpack.c.bf16 %v1011_v28, %v1010_v27  ;;  %v1412_v22 = vld [vmem:[%s2863_s23] ss:$0 sm:$0xff]  ;;  %s2866_s23 = sld [smem:[#allocation25_spill]] }
 0x1d3   : > { %1639 = vmatprep.mubr.f32.mxu1 %v662_v21 }
 0x1d4   : > { %1640 = vmatmul.mubr.f32.gmra.mrb[2].mxu1 %v663_v20 }
 0x1d5   : > { %1859 = vmatpush3.bf16.msra.mxu1 %v1856_v30  ;;  %v1029_v30 = vld [vmem:[#allocation11 + $0xc8] sm:$0xff] }
 0x1d6   : > { %1861 = vmatprep.subr.bf16.mxu1 %v1860_v33  ;;  %v1900_v32 = vpack.c.bf16 %v1029_v30, %v1028_v29 }
 0x1d9   : > { %1863 = vmatpush3.bf16.msra.mxu1 %v1860_v33  ;;  %v1012_v33 = vld [vmem:[#allocation11 + $0x40] sm:$0xff] }
 0x1da   : > { %1865 = vmatprep.subr.bf16.mxu1 %v1864_v36  ;;  %v1902_v37 = vpack.c.bf16 %v1013_v34, %v1012_v33 }
 0x1dd   : > { %1867 = vmatpush3.bf16.msra.mxu1 %v1864_v36  ;;  %v1031_v36 = vld [vmem:[#allocation11 + $0xd8] sm:$0xff] }
 0x1de   : > { %1869 = vmatprep.subr.bf16.mxu1 %v1868_v39  ;;  %v1904_v38 = vpack.c.bf16 %v1031_v36, %v1030_v35  ;;  %v1142_v35 = vld [vmem:[#allocation13 + $0x50] sm:$0xff]  ;;  %v1143_v36 = vld [vmem:[#allocation13 + $0x58] sm:$0xff] }
 0x1e1   : > { %1871 = vmatpush3.bf16.msra.mxu1 %v1868_v39  ;;  %v1014_v39 = vld [vmem:[#allocation11 + $0x50] sm:$0xff] }
 0x1e2   : > { %1873 = vmatprep.subr.bf16.mxu1 %v1872_v42 }
 0x1e5   : > { %1875 = vmatpush3.bf16.msra.mxu1 %v1872_v42  ;;  %v1033_v42 = vld [vmem:[#allocation11 + $0xe8] sm:$0xff] }
 0x1e6   : > { %1877 = vmatprep.subr.bf16.mxu1 %v1876_v58 }
 0x1e9   : > { %1879 = vmatpush3.bf16.msra.mxu1 %v1876_v58 }
 0x1ea   : > { %1881 = vmatprep.subr.bf16.mxu1 %v1880_v61 }
 0x1ed   : > { %1883 = vmatpush3.bf16.msra.mxu1 %v1880_v61 }
 0x2a3   : > { %v1638_v44 = vpop.f32.mrb[0].mxu1 }
 0x2a4   : > { %v759_v45 = vadd.f32 %v1638_v44, %v1410_v43  ;;  %v753_v46 = vpop.f32.mrb[1].mxu1  ;;  %v1908_v44 = vpack.c.bf16 %v1033_v42, %v1032_v41  ;;  %v1146_v41 = vld [vmem:[#allocation13 + $0x70] sm:$0xff]  ;;  %v1147_v42 = vld [vmem:[#allocation13 + $0x78] sm:$0xff] }
 0x2a5   : > { %v754_v47 = vadd.f32 %v1410_v43, %v753_v46  ;;  %v1017_v46 = vld [vmem:[#allocation11 + $0x68] sm:$0xff] }
 0x2a6   : > { %v773_v50 = vmax.f32 %v759_v45, 0.0  ;;  %v1016_v45 = vld [vmem:[#allocation11 + $0x60] sm:$0xff] }
 0x2a7   : > { %v772_v48 = vmax.f32 %v754_v47, 0.0  ;;  %v1641_v49 = vpop.f32.mrb[2].mxu1  ;;  %v1910_v47 = vpack.c.bf16 %v1017_v46, %v1016_v45  ;;  %v1413_v45 = vld [vmem:[%s2864_s15] ss:$0 sm:$0xff] }
 0x2a8   : > { %v769_v51 = vadd.f32 %v1641_v49, %v1410_v43  ;;  %v763_v52 = vpop.f32.mrb[3].mxu1 }
 0x2a9   : > { %v764_v53 = vadd.f32 %v1410_v43, %v763_v52  ;;  %1674 = vmatprep.mubr.f32.mxu0 %v772_v48  ;;  %v1906_v43 = vpack.c.bf16 %v1015_v40, %v1014_v39  ;;  %v1411_v48 = vld [vmem:[%s2862_s21] ss:$0 sm:$0xff]  ;;  %v1145_v39 = vld [vmem:[#allocation13 + $0x68] sm:$0xff]  ;;  %s1421_s21 = sshll.u32 %s2440_s14, 9  ;;  %s2346_s14 = smov [#allocation14]  }
 0x2aa   : > { %v775_v54 = vmax.f32 %v769_v51, 0.0  ;;  %1675 = vmatmul.mubr.f32.vlgmr.msra.gmra.mrb[4].mxu0 %v773_v50  ;;  %s2776_s24 = scalar_lea.hbm %s2866_s23, %s1421_s21  ;;  %s2261_s15 = sshll.u32 %s2346_s14, 4  ;;  %s2262_s15 = int_to_ptr.vmem [resolvable:$false] %s2261_s15 }
 0x2ab   : > { %v774_v55 = vmax.f32 %v764_v53, 0.0  ;;  %1887 = vmatpush3.bf16.msra.mxu0 %v1886_v5  ;;  %v1136_v5 = vld [vmem:[#allocation13 + $0x20] sm:$0xff]  ;;  %s2263_s22 = scalar_lea.vmem %s2262_s15, 1024  ;;  %p2264_p13 = scmp.lt.s32.totalorder %s2771_s20, %s2262_s15 }
 0x2ac   : > { %1889 = vmatprep.subr.bf16.mxu0 %v1888_v6  ;;  %v1137_v6 = vld [vmem:[#allocation13 + $0x28] sm:$0xff]  ;;  %p2265_p0 = scmp.lt.s32.totalorder %s2263_s22, %s2257_s1 }
 0x2ad   : > { %1677 = vmatprep.mubr.f32.mxu0 %v774_v55  ;;  %v1924_v7 = vpack.c.bf16 %v1137_v6, %v1136_v5 }
 0x2ae   : > { %1678 = vmatmul.mubr.f32.gmra.mrb[6].mxu0 %v775_v54  ;;  %p2266_p2 = por %p2265_p0, %p2264_p13 }
 0x2af   : > { %1891 = vmatpush3.bf16.msra.mxu0 %v1890_v12  ;;  %v1140_v12 = vld [vmem:[#allocation13 + $0x40] sm:$0xff] }
 0x2b0   : > { %1893 = vmatprep.subr.bf16.mxu0 %v1892_v15  ;;  %v1141_v15 = vld [vmem:[#allocation13 + $0x48] sm:$0xff]  ;;  %p2267_p7 = pnand %p2266_p2, %p2260_p1 }
 0x2b1   : > { %v1932_v18 = vpack.c.bf16 %v1141_v15, %v1140_v12 }
 0x2b3   : > { %1895 = vmatpush3.bf16.msra.mxu0 %v1894_v25 }
 0x2b4   : > { %1897 = vmatprep.subr.bf16.mxu0 %v1896_v26 }
 0x2b7   : > { %1899 = vmatpush3.bf16.msra.mxu0 %v1898_v31 }
 0x2b8   : > { %1901 = vmatprep.subr.bf16.mxu0 %v1900_v32 }
 0x2bb   : > { %1903 = vmatpush3.bf16.msra.mxu0 %v1902_v37  ;;  %v1936_v37 = vpack.c.bf16 %v1143_v36, %v1142_v35 }
 0x2bc   : > { %1905 = vmatprep.subr.bf16.mxu0 %v1904_v38  ;;  %v1144_v38 = vld [vmem:[#allocation13 + $0x60] sm:$0xff] }
 0x2bd   : > { %v1940_v40 = vpack.c.bf16 %v1145_v39, %v1144_v38 }
 0x2bf   : > { %1907 = vmatpush3.bf16.msra.mxu0 %v1906_v43  ;;  %v1944_v43 = vpack.c.bf16 %v1147_v42, %v1146_v41 }
 0x2c0   : > { %1909 = vmatprep.subr.bf16.mxu0 %v1908_v44 }
 0x2c3   : > { %1911 = vmatpush3.bf16.msra.mxu0 %v1910_v47 }
 0x37d   : > { %v1676_v49 = vpop.f32.mrb[4].mxu0 }
 0x37e   : > { %v871_v50 = vadd.f32 %v1676_v49, %v1411_v48  ;;  %v865_v51 = vpop.f32.mrb[5].mxu0 }
 0x37f   : > { %v866_v52 = vadd.f32 %v1411_v48, %v865_v51 }
 0x380   : > { %v885_v53 = vadd.f32 %v871_v50, %v661_v16 }
 0x381   : > { %v884_v54 = vadd.f32 %v866_v52, %v660_v14  ;;  %v1679_v55 = vpop.f32.mrb[6].mxu0  ;;  %v1035_v14 = vld [vmem:[#allocation11 + $0xf8] sm:$0xff] }
 0x382   : > { %v881_v56 = vadd.f32 %v1679_v55, %v1411_v48  ;;  %v875_v57 = vpop.f32.mrb[7].mxu0  ;;  %v889_v60 = vmax.f32 %v885_v53, 0.0  ;;  %v1912_v63 = vpack.c.bf16 %v1035_v14, %v1034_v13  ;;  %v1414_v13 = vld [vmem:[%s2865_s6] ss:$0 sm:$0xff] }
 0x383   : > { %v888_v58 = vmax.f32 %v884_v54, 0.0  ;;  %v876_v59 = vadd.f32 %v1411_v48, %v875_v57 }
 0x384   : > { %v887_v61 = vadd.f32 %v881_v56, %v663_v20  ;;  %1913 = vmatprep.subr.bf16.mxu0 %v1912_v63  ;;  %v1133_v20 = vld [vmem:[#allocation13 + $0x8] sm:$0xff] }
 0x385   : > { %v886_v62 = vadd.f32 %v876_v59, %v662_v21  ;;  %1712 = vmatprep.mubr.f32.mxu1 %v888_v58  ;;  %1107 = vmatprep.mubr.f32.mxu0 %v888_v58  ;;  %v1916_v19 = vpack.c.bf16 %v1133_v20, %v1132_v17  ;;  %v1135_v21 = vld [vmem:[#allocation13 + $0x18] sm:$0xff] }
 0x386   : > { %1713 = vmatmul.mubr.f32.vlgmr.msra.gmra.mrb[4].mxu1 %v889_v60  ;;  %v891_v16 = vmax.f32 %v887_v61, 0.0  ;;  %1915 = vmatpush3.bf16.msra.mxu0 %v1914_v2  ;;  %v1920_v4 = vpack.c.bf16 %v1135_v21, %v1134_v3 }
 0x387   : > { %v890_v11 = vmax.f32 %v886_v62, 0.0  ;;  %1917 = vmatprep.subr.bf16.mxu1 %v1916_v19 }
 0x388   : > { %1919 = vmatpush3.bf16.msra.mxu1 %v1916_v19 }
 0x389   : > { %1715 = vmatprep.mubr.f32.mxu1 %v890_v11  ;;  %1921 = vmatprep.subr.bf16.mxu1 %v1920_v4 }
 0x38a   : > { %1716 = vmatmul.mubr.f32.gmra.mrb[6].mxu1 %v891_v16 }
 0x38c   : > { %1923 = vmatpush3.bf16.msra.mxu1 %v1920_v4 }
 0x38d   : > { %1925 = vmatprep.subr.bf16.mxu1 %v1924_v7 }
 0x390   : > { %1927 = vmatpush3.bf16.msra.mxu1 %v1924_v7 }
 0x391   : > { %1929 = vmatprep.subr.bf16.mxu1 %v1928_v10 }
 0x394   : > { %1931 = vmatpush3.bf16.msra.mxu1 %v1928_v10 }
 0x395   : > { %1933 = vmatprep.subr.bf16.mxu1 %v1932_v18 }
 0x398   : > { %1935 = vmatpush3.bf16.msra.mxu1 %v1932_v18 }
 0x399   : > { %1937 = vmatprep.subr.bf16.mxu1 %v1936_v37 }
 0x39c   : > { %1939 = vmatpush3.bf16.msra.mxu1 %v1936_v37 }
 0x39d   : > { %1941 = vmatprep.subr.bf16.mxu1 %v1940_v40 }
 0x3a0   : > { %1943 = vmatpush3.bf16.msra.mxu1 %v1940_v40 }
 0x3a1   : > { %1945 = vmatprep.subr.bf16.mxu1 %v1944_v43 }
 0x3a4   : > { %1947 = vmatpush3.bf16.msra.mxu1 %v1944_v43 }
 0x459   : > { %v1714_v23 = vpop.f32.mrb[4].mxu1 }
 0x45a   : > { %v981_v24 = vpop.f32.mrb[5].mxu1  ;;  %v987_v26 = vadd.f32 %v1714_v23, %v1412_v22 }
 0x45b   : > { %v982_v25 = vadd.f32 %v1412_v22, %v981_v24 }
 0x45c   : > { %v1001_v30 = vmax.f32 %v987_v26, 0.0 }
 0x45d   : > { %v1000_v27 = vmax.f32 %v982_v25, 0.0  ;;  %v1717_v28 = vpop.f32.mrb[6].mxu1 }
 0x45e   : > { %v991_v29 = vpop.f32.mrb[7].mxu1  ;;  %v997_v32 = vadd.f32 %v1717_v28, %v1412_v22 }
 0x45f   : > { %1108 = vmatmul.mubr.f32.vlgmr.msra.gmra.mrb[8].mxu0 %v1000_v27  ;;  %v992_v31 = vadd.f32 %v1412_v22, %v991_v29 }
 0x460   : > { %1112 = vmatprep.mubr.f32.mxu0 %v889_v60  ;;  %v1003_v34 = vmax.f32 %v997_v32, 0.0 }
 0x461   : > { %v1002_v33 = vmax.f32 %v992_v31, 0.0 }
 0x463   : > { %1113 = vmatmul.mubr.f32.gmra.mrb[10].mxu0 %v1001_v30 }
 0x464   : > { %1117 = vmatprep.mubr.f32.mxu0 %v890_v11 }
 0x467   : > { %1118 = vmatmul.mubr.f32.gmra.mrb[12].mxu0 %v1002_v33 }
 0x468   : > { %1122 = vmatprep.mubr.f32.mxu0 %v891_v16 }
 0x46b   : > { %1123 = vmatmul.mubr.f32.gmra.mrb[14].mxu0 %v1003_v34 }
 0x532   : > { %v1534_v44 = vpop.f32.mrb[8].mxu0 }
 0x533   : > { %v1535_v46 = vpop.f32.mrb[9].mxu0 }
 0x534   : > { %v1536_v47 = vadd.f32 %v1535_v46, %v1534_v44 }
 0x536   : > { %v1110_v48 = vadd.f32 %v1536_v47, %v1413_v45  ;;  %v1537_v49 = vpop.f32.mrb[10].mxu0 }
 0x537   : > { %v1538_v50 = vpop.f32.mrb[11].mxu0 }
 0x538   : > { %v1128_v51 = vmax.f32 %v1110_v48, 0.0  ;;  %v1539_v52 = vadd.f32 %v1538_v50, %v1537_v49 }
 0x53a   : > { %v1115_v53 = vadd.f32 %v1539_v52, %v1413_v45  ;;  %v1540_v54 = vpop.f32.mrb[12].mxu0  ;;  %1750 = vmatprep.mubr.f32.mxu1 %v1128_v51 }
 0x53b   : > { %v1541_v55 = vpop.f32.mrb[13].mxu0 }
 0x53c   : > { %v1129_v56 = vmax.f32 %v1115_v53, 0.0  ;;  %v1542_v57 = vadd.f32 %v1541_v55, %v1540_v54 }
 0x53e   : > { %v1120_v58 = vadd.f32 %v1542_v57, %v1413_v45  ;;  %v1543_v59 = vpop.f32.mrb[14].mxu0  ;;  %1751 = vmatmul.mubr.f32.vlgmr.msra.gmra.mrb[8].mxu1 %v1129_v56 }
 0x53f   : > { %v1544_v60 = vpop.f32.mrb[15].mxu0 }
 0x540   : > { %v1130_v61 = vmax.f32 %v1120_v58, 0.0  ;;  %v1545_v62 = vadd.f32 %v1544_v60, %v1543_v59 }
 0x542   : > { %v1125_v11 = vadd.f32 %v1545_v62, %v1413_v45  ;;  %1753 = vmatprep.mubr.f32.mxu1 %v1130_v61 }
 0x544   : > { %v1131_v16 = vmax.f32 %v1125_v11, 0.0 }
 0x546   : > { %1754 = vmatmul.mubr.f32.gmra.mrb[10].mxu1 %v1131_v16 }
 0x611   : > { %v1752_v14 = vpop.f32.mrb[8].mxu1 }
 0x612   : > { %v1227_v63 = vadd.f32 %v1752_v14, %v1414_v13  ;;  %v1221_v0 = vpop.f32.mrb[9].mxu1 }
 0x613   : > { %v1222_v1 = vadd.f32 %v1414_v13, %v1221_v0 }
 0x614   : > { %1241 = vst [vmem:[%s545_s10 + $0x8] sm:$0xff] %v1227_v63 }
 0x615   : > { %1240 = vst [vmem:[%s545_s10] sm:$0xff] %v1222_v1 }
 0x619   : > { %v1755_v2 = vpop.f32.mrb[10].mxu1 }
 0x61a   : > { %v1237_v17 = vadd.f32 %v1755_v2, %v1414_v13  ;;  %v1231_v20 = vpop.f32.mrb[11].mxu1 }
 0x61b   : > { %v1232_v3 = vadd.f32 %v1414_v13, %v1231_v20 }
 0x61c   : > { %1243 = vst [vmem:[%s545_s10 + $0x18] sm:$0xff] %v1237_v17 }
 0x61d   : > { %1242 = vst [vmem:[%s545_s10 + $0x10] sm:$0xff] %v1232_v3 }
 0x61e   : > { %2270 = shalt.err (!%p2267_p7)
}
 0x61f   : > { %s2271_s13 = scalar_lea.hbm %s2776_s24, 512  ;;  %s2275_s21 = scalar_lea.hbm %s2866_s23, 2048 }
 0x620   : > { %p2272_p9 = scmp.ne.s32.totalorder %s2776_s24, %s2271_s13  ;;  %p2276_p3 = scmp.lt.u32.totalorder %s2776_s24, %s2866_s23 }
 0x621   : > { %p2277_p4 = scmp.lt.u32.totalorder %s2275_s21, %s2271_s13  ;;  %p2279_p5 = scmp.lt.u32.totalorder %s2271_s13, %s2776_s24 }
 0x622   : > { %p2273_p10 = pnand %p2272_p9, %p2867_p8 }
 0x623   : > { %p2278_p6 = por %p2277_p4, %p2276_p3 }
 0x624   : > { %p2274_p11 = pneg %p2273_p10 }
 0x625   : > { %p2280_p12 = por %p2279_p5, %p2278_p6 }
 0x627   : > { %p2281_p1 = pnand %p2280_p12, %p2274_p11 }
 0x629   : > { %2284 = shalt.err (!%p2281_p1)
}
 0x62a   : > { %s2347_s1 = smov 128   ;;  %s2348_s14 = smov 8  }
 0x62b   : > { %1974 = dma.vmem_to_hbm [thread:$0]  (%p2867_p8), %s2771_s20, 512, %s2776_s24, %s1245_s18, %s2347_s1, %s2347_s1, %s2348_s14  }
 0x62c PF: > { %p2016_p13 = scmp.ge.s32.totalorder %s2335_s28, 2  ;;  %s1273_s15 = sand.u32 1, %s2323_s25  }
 0x62d   : > { %p2868_p0 = scmp.ne.s32.totalorder %s2852_s19, 0  ;;  %s1274_s22 = scalar_lea.sflag [#allocation4], %s1273_s15 }
 0x62f   : > { %p2000_p2 = pnand %p2016_p13, %p2868_p0 }
 0x631   : > { %2318 = dma.done.wait (!%p2000_p2), %s1274_s22, 512  }
 0x632   : > { %2320 = vsyncadd (!%p2000_p2), %s1274_s22, 4294966784  ;;  %p29_p7 = scmp.ge.s32.totalorder %s2612_s16, 6   ;;  %s2869_s25 = smov %s2327_s26 }
 0x633   : > { %s2870_s26 = smov %s2331_s27  ;;  %s2871_s27 = smov %s2623_s8 }
 0x634   : > { %s2872_s28 = smov %s2612_s16  ;;  %31 = sbr.rel (!%p29_p7) target bundleno = 15 (0xf), region = 141 }
 0x63b   :  { %1279 = vsyncpa [#allocation3], 1 }
 0x63c   :  { %1281 = vsyncpa [#allocation3 + $0x1], 1 }
 0x63d   :  { %1282 = vsyncpa [#allocation6], 1 }
 0x63e   :  { %1283 = vsyncpa [#allocation9], 1 }
 0x63f   :  { %1284 = vsyncpa [#allocation12], 1 }
 0x640   :  { %1285 = vsyncpa [#allocation4], 1 }
 0x641   :  { %1287 = vsyncpa [#allocation4 + $0x1], 1 }

</bundles_post_ra>
